<compile_context>
chip_gen: v7x
topology: tpu7x:2x2x1
jax: 0.10.0
libtpu: 0.0.40
codegen_flags: <defaults>
</compile_context>

<pallas_src>
import numpy as np
import jax
import jax.numpy as jnp
from jax.experimental import pallas as pl
from jax.experimental.pallas import tpu as pltpu

WIN = 11          # SSIM gaussian window size
PAD = WIN // 2    # = 5
SIGMA = 1.5
C1 = 0.01 ** 2
C2 = 0.03 ** 2


def _gauss_1d():
    x = np.arange(WIN, dtype=np.float64)
    g = np.exp(-((x - WIN // 2) ** 2) / (2.0 * SIGMA ** 2))
    return (g / g.sum()).astype(np.float32)


def _band_matrix(dim, g):
    # Truncated band matrix for a zero-padded 'same' 1-D convolution:
    #   (M @ x)[i] = sum_d g[d] * x[i + d - PAD]   (out-of-range terms are zero)
    M = np.zeros((dim, dim), np.float32)
    for d in range(WIN):
        off = d - PAD
        idx = np.arange(max(0, -off), min(dim, dim - off))
        M[idx, idx + off] = g[d]
    return M


def _l_ssim_kernel(a_ref, b_ref, f_ref, mh_ref, mwt_ref, red_ref, out_ref):
    # a/b/f : (H, Wp)   lane-packed image group (Wp = kW * W)
    # mh    : (H, H)    H-direction band matrix (left-multiplication)
    # mwt   : (Wp, Wp)  block-diagonal W-direction band matrix (transposed,
    #                   for right-multiplication; blocks keep images separate)
    # red   : (Wp, kW)  per-image column-sum reduction matrix (ones blocks)
    # out   : (2, kW)   per-image SSIM-map sums, row 0 = (A,F), row 1 = (B,F)
    f = f_ref[...]
    mh = mh_ref[...]
    mwt = mwt_ref[...]
    red = red_ref[...]

    dot_kw = dict(precision=jax.lax.Precision.HIGHEST,
                  preferred_element_type=jnp.float32)

    def blur(x):
        # Zero-padded 'same' 11x11 gaussian blur as two plain MXU matmuls.
        y = jnp.dot(x, mwt, **dot_kw)      # W direction
        return jnp.dot(mh, y, **dot_kw)    # H direction

    # Fused-image moments are shared by both pairs: blur once, keep resident.
    mu_f = blur(f)
    mu_f2 = mu_f * mu_f
    sig_ff_c2 = (blur(f * f) - mu_f2) + C2

    def pair_sums(x_ref):
        # Stream one (X, fused) pair: compute, blur, reduce, then discard.
        x = x_ref[...]
        mu_x = blur(x)
        e_xx = blur(x * x)
        e_xf = blur(x * f)
        mu_x2 = mu_x * mu_x
        sig_xx = e_xx - mu_x2
        sig_xf = e_xf - mu_x * mu_f
        num = (2.0 * mu_x * mu_f + C1) * (2.0 * sig_xf + C2)
        den = (mu_x2 + mu_f2 + C1) * (sig_xx + sig_ff_c2)
        # EUP reciprocal + one Newton step: moves the divide off the VALU
        # slots while keeping relative error ~1e-7 (well under tolerance).
        r = pl.reciprocal(den, approx=True)
        r = r * (2.0 - den * r)
        m = num * r
        cols = jnp.sum(m, axis=0, keepdims=True)   # (1, Wp)  sum over H
        return jnp.dot(cols, red, **dot_kw)        # (1, kW)  per-image sums

    s_af = pair_sums(a_ref)
    s_bf = pair_sums(b_ref)
    out_ref[...] = jnp.concatenate([s_af, s_bf], axis=0)   # (2, kW)


def _generation_params():
    """Generation-aware VMEM limit and lane-packing target."""
    vmem_cap = 128 << 20          # v5e / v6e physical
    lane_target = 256             # v6e / v7x MXU is 256 wide
    try:
        info = pltpu.get_tpu_info()
        vmem_cap = int(getattr(info, "vmem_capacity_bytes", vmem_cap))
    except Exception:
        pass
    try:
        kind = jax.devices()[0].device_kind.lower()
        if "v5" in kind:
            lane_target = 128     # match v5e's 128x128 MXU tiles
    except Exception:
        pass
    # Leave headroom below physical capacity: 128 MiB -> 96 MiB (v5e/v6e),
    # 64 MiB -> 48 MiB (v7x).
    vmem_limit = min(vmem_cap * 3 // 4, 100 << 20)
    return vmem_limit, lane_target


def _vmem_bytes_estimate(H, Wp, kW):
    plane = 4 * H * Wp
    # 3 double-buffered input planes + ~3 resident fused-image planes +
    # ~10 transient planes for one streamed (x, x*x, x*f) pair, plus the
    # (double-buffered) blur / reduction weights and some slack.
    return (6 + 3 + 10) * plane + 8 * (H * H + Wp * Wp + Wp * kW) + (2 << 20)


def l_ssim(image_A, image_B, image_fused):
    """Pallas implementation of L_SSIM.forward (scalar loss)."""
    B, C, H, W = image_A.shape
    N = B * C   # grouped per-channel SSIM conv + global mean == flat images

    a = image_A.reshape(N, H, W).astype(jnp.float32)
    b = image_B.reshape(N, H, W).astype(jnp.float32)
    f = image_fused.reshape(N, H, W).astype(jnp.float32)

    vmem_limit, lane_target = _generation_params()

    # ---- lane packing / grid sizing ----
    kW = max(1, lane_target // W)      # images packed per group along lanes
    kW = min(kW, N)
    num_groups = -(-N // kW)
    if num_groups < 2 and N >= 2:
        # Keep >= 2 grid steps so the "parallel" axis can be sharded across
        # both v7x TensorCores.
        kW = (N + 1) // 2
        num_groups = -(-N // kW)
    Wp = kW * W
    Np = num_groups * kW

    est = _vmem_bytes_estimate(H, Wp, kW)
    if est > vmem_limit:
        # TODO(synk): halo-tiled (2*PAD overlap) H/W-chunked blur for very
        # large images; required once the streamed working set exceeds VMEM.
        raise NotImplementedError(
            f"l_ssim: per-step working set ~{est >> 20} MiB exceeds the "
            f"{vmem_limit >> 20} MiB VMEM budget (H/W halo tiling not "
            "implemented).")

    if Np != N:
        pad = ((0, Np - N), (0, 0), (0, 0))
        a, b, f = jnp.pad(a, pad), jnp.pad(b, pad), jnp.pad(f, pad)

    def pack(x):   # (Np, H, W) -> (num_groups, H, kW*W): images side-by-side
        return x.reshape(num_groups, kW, H, W).transpose(0, 2, 1, 3).reshape(
            num_groups, H, Wp)

    a, b, f = pack(a), pack(b), pack(f)

    g = _gauss_1d()
    eye_k = np.eye(kW, dtype=np.float32)
    mh = jnp.asarray(_band_matrix(H, g))                               # (H, H)
    mwt = jnp.asarray(np.kron(eye_k, _band_matrix(W, g).T))            # (Wp, Wp)
    red = jnp.asarray(np.kron(eye_k, np.ones((W, 1), np.float32)))     # (Wp, kW)

    sums = pl.pallas_call(
        _l_ssim_kernel,
        out_shape=jax.ShapeDtypeStruct((num_groups, 2, kW), jnp.float32),
        grid_spec=pltpu.PrefetchScalarGridSpec(
            num_scalar_prefetch=0,
            grid=(num_groups,),
            in_specs=[
                pl.BlockSpec((None, H, Wp), lambda n: (n, 0, 0)),
                pl.BlockSpec((None, H, Wp), lambda n: (n, 0, 0)),
                pl.BlockSpec((None, H, Wp), lambda n: (n, 0, 0)),
                pl.BlockSpec((H, H), lambda n: (0, 0)),
                pl.BlockSpec((Wp, Wp), lambda n: (0, 0)),
                pl.BlockSpec((Wp, kW), lambda n: (0, 0)),
            ],
            out_specs=pl.BlockSpec((None, 2, kW), lambda n: (n, 0, 0)),
        ),
        compiler_params=pltpu.CompilerParams(
            dimension_semantics=("parallel",),
            vmem_limit_bytes=vmem_limit),
    )(a, b, f, mh, mwt, red)

    # (num_groups, 2, kW) -> (2, Np); drop padded (all-zero) dummy images.
    per_image = sums.transpose(1, 0, 2).reshape(2, Np)[:, :N]
    total = jnp.float32(N * H * W)
    ssim_AF = jnp.sum(per_image[0]) / total
    ssim_BF = jnp.sum(per_image[1]) / total
    return 0.5 * ssim_AF + 0.5 * ssim_BF


# ---- pure-JAX reference (for verification) ----
def _ssim_ref(img1, img2):
    g = _gauss_1d()
    C = img1.shape[1]
    win = jnp.asarray(np.tile(np.outer(g, g)[None, None], (C, 1, 1, 1)))

    def conv(x):
        return jax.lax.conv_general_dilated(
            x, win, window_strides=(1, 1), padding=[(PAD, PAD), (PAD, PAD)],
            dimension_numbers=("NCHW", "OIHW", "NCHW"),
            feature_group_count=C,
            precision=jax.lax.Precision.HIGHEST)

    mu1, mu2 = conv(img1), conv(img2)
    mu1_sq, mu2_sq, mu12 = mu1 * mu1, mu2 * mu2, mu1 * mu2
    s1 = conv(img1 * img1) - mu1_sq
    s2 = conv(img2 * img2) - mu2_sq
    s12 = conv(img1 * img2) - mu12
    m = ((2 * mu12 + C1) * (2 * s12 + C2)) / ((mu1_sq + mu2_sq + C1) * (s1 + s2 + C2))
    return jnp.mean(m)


if __name__ == "__main__":
    key = jax.random.PRNGKey(0)
    kA, kB, kF = jax.random.split(key, 3)
    B, C, H, W = 2, 1, 16, 16
    image_A = jax.random.uniform(kA, (B, C, H, W), dtype=jnp.float32)
    image_B = jax.random.uniform(kB, (B, C, H, W), dtype=jnp.float32)
    image_F = jax.random.uniform(kF, (B, C, H, W), dtype=jnp.float32)

    loss = jax.block_until_ready(l_ssim(image_A, image_B, image_F))

    ref = 0.5 * _ssim_ref(image_A, image_F) + 0.5 * _ssim_ref(image_B, image_F)
    ref = jax.block_until_ready(ref)

    assert np.isfinite(float(loss))
    np.testing.assert_allclose(float(loss), float(ref), rtol=5e-4, atol=1e-5)
    print("KERNEL_OK")
</pallas_src>

<mosaic_0001>
module attributes {stable_mosaic.version = 11 : i64} {
  func.func @_l_ssim_kernel(%arg0: i32, %arg1: memref<1x16x16xf32, #tpu.memory_space<vmem>>, %arg2: memref<1x16x16xf32, #tpu.memory_space<vmem>>, %arg3: memref<1x16x16xf32, #tpu.memory_space<vmem>>, %arg4: memref<16x16xf32, #tpu.memory_space<vmem>>, %arg5: memref<16x16xf32, #tpu.memory_space<vmem>>, %arg6: memref<16x1xf32, #tpu.memory_space<vmem>>, %arg7: memref<1x2x1xf32, #tpu.memory_space<vmem>>) attributes {dimension_semantics = [#tpu.dimension_semantics<parallel>], iteration_bounds = array<i64: 2>, scalar_prefetch = 0 : i64, scratch_operands = 0 : i64, tpu.core_type = #tpu.core_type<tc>, window_params = [{transform_indices = @transform_0, window_bounds = array<i64: 1, 16, 16>}, {transform_indices = @transform_1, window_bounds = array<i64: 1, 16, 16>}, {transform_indices = @transform_2, window_bounds = array<i64: 1, 16, 16>}, {pipeline_mode = #tpu.pipeline_mode<synchronous>, transform_indices = @transform_3, window_bounds = array<i64: 16, 16>}, {pipeline_mode = #tpu.pipeline_mode<synchronous>, transform_indices = @transform_4, window_bounds = array<i64: 16, 16>}, {pipeline_mode = #tpu.pipeline_mode<synchronous>, transform_indices = @transform_5, window_bounds = array<i64: 16, 1>}, {transform_indices = @transform_6, window_bounds = array<i64: 1, 2, 1>}]} {
    %c0 = arith.constant 0 : index
    %c0_0 = arith.constant 0 : index
    %c0_1 = arith.constant 0 : index
    %0 = vector.load %arg3[%c0, %c0_0, %c0_1] : memref<1x16x16xf32, #tpu.memory_space<vmem>>, vector<1x16x16xf32>
    %1 = vector.shape_cast %0 : vector<1x16x16xf32> to vector<16x16xf32>
    %c0_2 = arith.constant 0 : index
    %c0_3 = arith.constant 0 : index
    %2 = vector.load %arg4[%c0_2, %c0_3] : memref<16x16xf32, #tpu.memory_space<vmem>>, vector<16x16xf32>
    %c0_4 = arith.constant 0 : index
    %c0_5 = arith.constant 0 : index
    %3 = vector.load %arg5[%c0_4, %c0_5] : memref<16x16xf32, #tpu.memory_space<vmem>>, vector<16x16xf32>
    %c0_6 = arith.constant 0 : index
    %c0_7 = arith.constant 0 : index
    %4 = vector.load %arg6[%c0_6, %c0_7] : memref<16x1xf32, #tpu.memory_space<vmem>>, vector<16x1xf32>
    %cst = arith.constant dense<0.000000e+00> : vector<16x16xf32>
    %5 = tpu.matmul %1, %3, %cst {dimension_numbers = #tpu.dot_dimension_numbers<[1], [0], [0], [1], [0, 0, 1, 1], [], []>, precision = #tpu.contract_precision<fp32>} : vector<16x16xf32>, vector<16x16xf32>, vector<16x16xf32> -> vector<16x16xf32>
    %cst_8 = arith.constant dense<0.000000e+00> : vector<16x16xf32>
    %6 = tpu.matmul %2, %5, %cst_8 {dimension_numbers = #tpu.dot_dimension_numbers<[1], [0], [0], [1], [0, 0, 1, 1], [], []>, precision = #tpu.contract_precision<fp32>} : vector<16x16xf32>, vector<16x16xf32>, vector<16x16xf32> -> vector<16x16xf32>
    %7 = arith.mulf %6, %6 : vector<16x16xf32>
    %8 = arith.mulf %1, %1 : vector<16x16xf32>
    %cst_9 = arith.constant dense<0.000000e+00> : vector<16x16xf32>
    %9 = tpu.matmul %8, %3, %cst_9 {dimension_numbers = #tpu.dot_dimension_numbers<[1], [0], [0], [1], [0, 0, 1, 1], [], []>, precision = #tpu.contract_precision<fp32>} : vector<16x16xf32>, vector<16x16xf32>, vector<16x16xf32> -> vector<16x16xf32>
    %cst_10 = arith.constant dense<0.000000e+00> : vector<16x16xf32>
    %10 = tpu.matmul %2, %9, %cst_10 {dimension_numbers = #tpu.dot_dimension_numbers<[1], [0], [0], [1], [0, 0, 1, 1], [], []>, precision = #tpu.contract_precision<fp32>} : vector<16x16xf32>, vector<16x16xf32>, vector<16x16xf32> -> vector<16x16xf32>
    %11 = arith.subf %10, %7 : vector<16x16xf32>
    %cst_11 = arith.constant 8.99999984E-4 : f32
    %12 = vector.broadcast %cst_11 : f32 to vector<16x16xf32>
    %13 = arith.addf %11, %12 : vector<16x16xf32>
    %c0_12 = arith.constant 0 : index
    %c0_13 = arith.constant 0 : index
    %c0_14 = arith.constant 0 : index
    %14 = vector.load %arg1[%c0_12, %c0_13, %c0_14] : memref<1x16x16xf32, #tpu.memory_space<vmem>>, vector<1x16x16xf32>
    %15 = vector.shape_cast %14 : vector<1x16x16xf32> to vector<16x16xf32>
    %cst_15 = arith.constant dense<0.000000e+00> : vector<16x16xf32>
    %16 = tpu.matmul %15, %3, %cst_15 {dimension_numbers = #tpu.dot_dimension_numbers<[1], [0], [0], [1], [0, 0, 1, 1], [], []>, precision = #tpu.contract_precision<fp32>} : vector<16x16xf32>, vector<16x16xf32>, vector<16x16xf32> -> vector<16x16xf32>
    %cst_16 = arith.constant dense<0.000000e+00> : vector<16x16xf32>
    %17 = tpu.matmul %2, %16, %cst_16 {dimension_numbers = #tpu.dot_dimension_numbers<[1], [0], [0], [1], [0, 0, 1, 1], [], []>, precision = #tpu.contract_precision<fp32>} : vector<16x16xf32>, vector<16x16xf32>, vector<16x16xf32> -> vector<16x16xf32>
    %18 = arith.mulf %15, %15 : vector<16x16xf32>
    %cst_17 = arith.constant dense<0.000000e+00> : vector<16x16xf32>
    %19 = tpu.matmul %18, %3, %cst_17 {dimension_numbers = #tpu.dot_dimension_numbers<[1], [0], [0], [1], [0, 0, 1, 1], [], []>, precision = #tpu.contract_precision<fp32>} : vector<16x16xf32>, vector<16x16xf32>, vector<16x16xf32> -> vector<16x16xf32>
    %cst_18 = arith.constant dense<0.000000e+00> : vector<16x16xf32>
    %20 = tpu.matmul %2, %19, %cst_18 {dimension_numbers = #tpu.dot_dimension_numbers<[1], [0], [0], [1], [0, 0, 1, 1], [], []>, precision = #tpu.contract_precision<fp32>} : vector<16x16xf32>, vector<16x16xf32>, vector<16x16xf32> -> vector<16x16xf32>
    %21 = arith.mulf %15, %1 : vector<16x16xf32>
    %cst_19 = arith.constant dense<0.000000e+00> : vector<16x16xf32>
    %22 = tpu.matmul %21, %3, %cst_19 {dimension_numbers = #tpu.dot_dimension_numbers<[1], [0], [0], [1], [0, 0, 1, 1], [], []>, precision = #tpu.contract_precision<fp32>} : vector<16x16xf32>, vector<16x16xf32>, vector<16x16xf32> -> vector<16x16xf32>
    %cst_20 = arith.constant dense<0.000000e+00> : vector<16x16xf32>
    %23 = tpu.matmul %2, %22, %cst_20 {dimension_numbers = #tpu.dot_dimension_numbers<[1], [0], [0], [1], [0, 0, 1, 1], [], []>, precision = #tpu.contract_precision<fp32>} : vector<16x16xf32>, vector<16x16xf32>, vector<16x16xf32> -> vector<16x16xf32>
    %24 = arith.mulf %17, %17 : vector<16x16xf32>
    %25 = arith.subf %20, %24 : vector<16x16xf32>
    %26 = arith.mulf %17, %6 : vector<16x16xf32>
    %27 = arith.subf %23, %26 : vector<16x16xf32>
    %cst_21 = arith.constant 2.000000e+00 : f32
    %28 = vector.broadcast %cst_21 : f32 to vector<16x16xf32>
    %29 = arith.mulf %28, %17 : vector<16x16xf32>
    %30 = arith.mulf %29, %6 : vector<16x16xf32>
    %cst_22 = arith.constant 9.99999974E-5 : f32
    %31 = vector.broadcast %cst_22 : f32 to vector<16x16xf32>
    %32 = arith.addf %30, %31 : vector<16x16xf32>
    %cst_23 = arith.constant 2.000000e+00 : f32
    %33 = vector.broadcast %cst_23 : f32 to vector<16x16xf32>
    %34 = arith.mulf %33, %27 : vector<16x16xf32>
    %cst_24 = arith.constant 8.99999984E-4 : f32
    %35 = vector.broadcast %cst_24 : f32 to vector<16x16xf32>
    %36 = arith.addf %34, %35 : vector<16x16xf32>
    %37 = arith.mulf %32, %36 : vector<16x16xf32>
    %38 = arith.addf %24, %7 : vector<16x16xf32>
    %cst_25 = arith.constant 9.99999974E-5 : f32
    %39 = vector.broadcast %cst_25 : f32 to vector<16x16xf32>
    %40 = arith.addf %38, %39 : vector<16x16xf32>
    %41 = arith.addf %25, %13 : vector<16x16xf32>
    %42 = arith.mulf %40, %41 : vector<16x16xf32>
    %43 = tpu.reciprocal %42 {approx = true} : vector<16x16xf32> -> vector<16x16xf32>
    %44 = arith.mulf %42, %43 : vector<16x16xf32>
    %cst_26 = arith.constant 2.000000e+00 : f32
    %45 = vector.broadcast %cst_26 : f32 to vector<16x16xf32>
    %46 = arith.subf %45, %44 : vector<16x16xf32>
    %47 = arith.mulf %43, %46 : vector<16x16xf32>
    %48 = arith.mulf %37, %47 : vector<16x16xf32>
    %cst_27 = arith.constant dense<0.000000e+00> : vector<16xf32>
    %49 = vector.multi_reduction <add>, %48, %cst_27 [0] : vector<16x16xf32> to vector<16xf32>
    %50 = vector.shape_cast %49 : vector<16xf32> to vector<1x16xf32>
    %cst_28 = arith.constant dense<0.000000e+00> : vector<1x1xf32>
    %51 = tpu.matmul %50, %4, %cst_28 {dimension_numbers = #tpu.dot_dimension_numbers<[1], [0], [0], [1], [0, 0, 1, 1], [], []>, precision = #tpu.contract_precision<fp32>} : vector<1x16xf32>, vector<16x1xf32>, vector<1x1xf32> -> vector<1x1xf32>
    %c0_29 = arith.constant 0 : index
    %c0_30 = arith.constant 0 : index
    %c0_31 = arith.constant 0 : index
    %52 = vector.load %arg2[%c0_29, %c0_30, %c0_31] : memref<1x16x16xf32, #tpu.memory_space<vmem>>, vector<1x16x16xf32>
    %53 = vector.shape_cast %52 : vector<1x16x16xf32> to vector<16x16xf32>
    %cst_32 = arith.constant dense<0.000000e+00> : vector<16x16xf32>
    %54 = tpu.matmul %53, %3, %cst_32 {dimension_numbers = #tpu.dot_dimension_numbers<[1], [0], [0], [1], [0, 0, 1, 1], [], []>, precision = #tpu.contract_precision<fp32>} : vector<16x16xf32>, vector<16x16xf32>, vector<16x16xf32> -> vector<16x16xf32>
    %cst_33 = arith.constant dense<0.000000e+00> : vector<16x16xf32>
    %55 = tpu.matmul %2, %54, %cst_33 {dimension_numbers = #tpu.dot_dimension_numbers<[1], [0], [0], [1], [0, 0, 1, 1], [], []>, precision = #tpu.contract_precision<fp32>} : vector<16x16xf32>, vector<16x16xf32>, vector<16x16xf32> -> vector<16x16xf32>
    %56 = arith.mulf %53, %53 : vector<16x16xf32>
    %cst_34 = arith.constant dense<0.000000e+00> : vector<16x16xf32>
    %57 = tpu.matmul %56, %3, %cst_34 {dimension_numbers = #tpu.dot_dimension_numbers<[1], [0], [0], [1], [0, 0, 1, 1], [], []>, precision = #tpu.contract_precision<fp32>} : vector<16x16xf32>, vector<16x16xf32>, vector<16x16xf32> -> vector<16x16xf32>
    %cst_35 = arith.constant dense<0.000000e+00> : vector<16x16xf32>
    %58 = tpu.matmul %2, %57, %cst_35 {dimension_numbers = #tpu.dot_dimension_numbers<[1], [0], [0], [1], [0, 0, 1, 1], [], []>, precision = #tpu.contract_precision<fp32>} : vector<16x16xf32>, vector<16x16xf32>, vector<16x16xf32> -> vector<16x16xf32>
    %59 = arith.mulf %53, %1 : vector<16x16xf32>
    %cst_36 = arith.constant dense<0.000000e+00> : vector<16x16xf32>
    %60 = tpu.matmul %59, %3, %cst_36 {dimension_numbers = #tpu.dot_dimension_numbers<[1], [0], [0], [1], [0, 0, 1, 1], [], []>, precision = #tpu.contract_precision<fp32>} : vector<16x16xf32>, vector<16x16xf32>, vector<16x16xf32> -> vector<16x16xf32>
    %cst_37 = arith.constant dense<0.000000e+00> : vector<16x16xf32>
    %61 = tpu.matmul %2, %60, %cst_37 {dimension_numbers = #tpu.dot_dimension_numbers<[1], [0], [0], [1], [0, 0, 1, 1], [], []>, precision = #tpu.contract_precision<fp32>} : vector<16x16xf32>, vector<16x16xf32>, vector<16x16xf32> -> vector<16x16xf32>
    %62 = arith.mulf %55, %55 : vector<16x16xf32>
    %63 = arith.subf %58, %62 : vector<16x16xf32>
    %64 = arith.mulf %55, %6 : vector<16x16xf32>
    %65 = arith.subf %61, %64 : vector<16x16xf32>
    %cst_38 = arith.constant 2.000000e+00 : f32
    %66 = vector.broadcast %cst_38 : f32 to vector<16x16xf32>
    %67 = arith.mulf %66, %55 : vector<16x16xf32>
    %68 = arith.mulf %67, %6 : vector<16x16xf32>
    %cst_39 = arith.constant 9.99999974E-5 : f32
    %69 = vector.broadcast %cst_39 : f32 to vector<16x16xf32>
    %70 = arith.addf %68, %69 : vector<16x16xf32>
    %cst_40 = arith.constant 2.000000e+00 : f32
    %71 = vector.broadcast %cst_40 : f32 to vector<16x16xf32>
    %72 = arith.mulf %71, %65 : vector<16x16xf32>
    %cst_41 = arith.constant 8.99999984E-4 : f32
    %73 = vector.broadcast %cst_41 : f32 to vector<16x16xf32>
    %74 = arith.addf %72, %73 : vector<16x16xf32>
    %75 = arith.mulf %70, %74 : vector<16x16xf32>
    %76 = arith.addf %62, %7 : vector<16x16xf32>
    %cst_42 = arith.constant 9.99999974E-5 : f32
    %77 = vector.broadcast %cst_42 : f32 to vector<16x16xf32>
    %78 = arith.addf %76, %77 : vector<16x16xf32>
    %79 = arith.addf %63, %13 : vector<16x16xf32>
    %80 = arith.mulf %78, %79 : vector<16x16xf32>
    %81 = tpu.reciprocal %80 {approx = true} : vector<16x16xf32> -> vector<16x16xf32>
    %82 = arith.mulf %80, %81 : vector<16x16xf32>
    %cst_43 = arith.constant 2.000000e+00 : f32
    %83 = vector.broadcast %cst_43 : f32 to vector<16x16xf32>
    %84 = arith.subf %83, %82 : vector<16x16xf32>
    %85 = arith.mulf %81, %84 : vector<16x16xf32>
    %86 = arith.mulf %75, %85 : vector<16x16xf32>
    %cst_44 = arith.constant dense<0.000000e+00> : vector<16xf32>
    %87 = vector.multi_reduction <add>, %86, %cst_44 [0] : vector<16x16xf32> to vector<16xf32>
    %88 = vector.shape_cast %87 : vector<16xf32> to vector<1x16xf32>
    %cst_45 = arith.constant dense<0.000000e+00> : vector<1x1xf32>
    %89 = tpu.matmul %88, %4, %cst_45 {dimension_numbers = #tpu.dot_dimension_numbers<[1], [0], [0], [1], [0, 0, 1, 1], [], []>, precision = #tpu.contract_precision<fp32>} : vector<1x16xf32>, vector<16x1xf32>, vector<1x1xf32> -> vector<1x1xf32>
    %90 = tpu.concatenate %51, %89 in 0 : vector<1x1xf32>, vector<1x1xf32> -> vector<2x1xf32>
    %c0_46 = arith.constant 0 : index
    %c0_47 = arith.constant 0 : index
    %c0_48 = arith.constant 0 : index
    %91 = vector.load %arg7[%c0_46, %c0_47, %c0_48] : memref<1x2x1xf32, #tpu.memory_space<vmem>>, vector<1x2x1xf32>
    %92 = vector.shape_cast %91 : vector<1x2x1xf32> to vector<2x1xf32>
    %93 = vector.shape_cast %90 : vector<2x1xf32> to vector<1x2x1xf32>
    tpu.vector_store %arg7[%c0_46, %c0_47, %c0_48], %93 {strides = array<i32>} : memref<1x2x1xf32, #tpu.memory_space<vmem>>, vector<1x2x1xf32>,
    return
  }
  func.func @transform_0(%arg0: i32) -> (i32, i32, i32) {
    %c0_i32 = arith.constant 0 : i32
    %c0_i32_0 = arith.constant 0 : i32
    %c0_i32_1 = arith.constant 0 : i32
    return %arg0, %c0_i32, %c0_i32_0 : i32, i32, i32
  }
  func.func @transform_1(%arg0: i32) -> (i32, i32, i32) {
    %c0_i32 = arith.constant 0 : i32
    %c0_i32_0 = arith.constant 0 : i32
    %c0_i32_1 = arith.constant 0 : i32
    return %arg0, %c0_i32, %c0_i32_0 : i32, i32, i32
  }
  func.func @transform_2(%arg0: i32) -> (i32, i32, i32) {
    %c0_i32 = arith.constant 0 : i32
    %c0_i32_0 = arith.constant 0 : i32
    %c0_i32_1 = arith.constant 0 : i32
    return %arg0, %c0_i32, %c0_i32_0 : i32, i32, i32
  }
  func.func @transform_3(%arg0: i32) -> (i32, i32) {
    %c0_i32 = arith.constant 0 : i32
    %c0_i32_0 = arith.constant 0 : i32
    %c0_i32_1 = arith.constant 0 : i32
    return %c0_i32, %c0_i32_0 : i32, i32
  }
  func.func @transform_4(%arg0: i32) -> (i32, i32) {
    %c0_i32 = arith.constant 0 : i32
    %c0_i32_0 = arith.constant 0 : i32
    %c0_i32_1 = arith.constant 0 : i32
    return %c0_i32, %c0_i32_0 : i32, i32
  }
  func.func @transform_5(%arg0: i32) -> (i32, i32) {
    %c0_i32 = arith.constant 0 : i32
    %c0_i32_0 = arith.constant 0 : i32
    %c0_i32_1 = arith.constant 0 : i32
    return %c0_i32, %c0_i32_0 : i32, i32
  }
  func.func @transform_6(%arg0: i32) -> (i32, i32, i32) {
    %c0_i32 = arith.constant 0 : i32
    %c0_i32_0 = arith.constant 0 : i32
    %c0_i32_1 = arith.constant 0 : i32
    return %arg0, %c0_i32, %c0_i32_0 : i32, i32, i32
  }
}

</mosaic_0001>

<bundles_post_ra>
// kernel: tpu_custom_call.1
= control target key start
LH: loop header
LB: loop body
LE: loop exit
PB: predicated region body
PF: predicated region fallthrough
CT: control target
= control target key end

     0   :  { %s12651_s0 = inlined_call_operand.hbm [shape: f32[2,16,16], index: 0, kind: input, shape index: {}]   ;;  %s12652_s1 = inlined_call_operand.hbm [shape: f32[2,16,16], index: 1, kind: input, shape index: {}]   ;;  %s12653_s2 = inlined_call_operand.hbm [shape: f32[2,16,16], index: 2, kind: input, shape index: {}]   ;;  %s12654_s3 = inlined_call_operand.hbm [shape: f32[16,16], index: 3, kind: input, shape index: {}]   ;;  %s12655_s4 = inlined_call_operand.hbm [shape: f32[16,16], index: 4, kind: input, shape index: {}]   ;;  %s12656_s5 = inlined_call_operand.hbm [shape: f32[16,1], index: 5, kind: input, shape index: {}]   ;;  %s12657_s6 = inlined_call_operand.hbm [shape: f32[2,2,1], index: 6, kind: output, shape index: {}]  }
   0x1   :  { %12683 = sst [smem:[#allocation25_spill]] %s12652_s1 }
   0x2   :  { %12684 = sst [smem:[#allocation26_spill]] %s12654_s3 }
   0x3   :  { %12685 = sst [smem:[#allocation27_spill]] %s12657_s6 }
   0x4   :  { %11 = vsyncpa [#allocation3], 0 }
   0x5   :  { %13 = vsyncpa [#allocation3 + $0x1], 0 }
   0x6   :  { %14 = vsyncpa [#allocation6], 0 }
   0x7   :  { %16 = vsyncpa [#allocation6 + $0x1], 0 }
   0x8   :  { %17 = vsyncpa [#allocation9], 0 }
   0x9   :  { %18 = vsyncpa [#allocation12], 0 }
   0xa   :  { %19 = vsyncpa [#allocation4], 0 }
   0xb   :  { %21 = vsyncpa [#allocation4 + $0x1], 0  ;;  %s11894_s21 = smov 0   ;;  %s11896_s22 = smov 0  }
   0xc   :  { %s11898_s23 = smov 0   ;;  %s11900_s24 = smov 0  }
   0xd LB: > { %12686 = sst [smem:[#allocation19_spill]] %s11833_s21  ;;  %s11915_s25 = sadd.s32 4294967295, %s11845_s24   ;;  %s11845_s24 = sphi %s11900_s24, %s12726_s24   ;;  %s11841_s23 = sphi %s11898_s23, %s12730_s23   ;;  %s11837_s22 = sphi %s11896_s22, %s12729_s22   ;;  %s11833_s21 = sphi %s11894_s21, %s12728_s21  }
   0xe   : > { %12687 = sst [smem:[#allocation20_spill]] %s11845_s24  ;;  %s9687_s26 = sadd.s32 4294967294, %s11845_s24  }
   0xf   : > { %s11919_s27 = sadd.s32 1, %s11845_s24   ;;  %s34_s28 = sadd.s32 1, %s11841_s23 }
  0x10   : > { %12688 = sst [smem:[#allocation21_spill]] %s11919_s27  ;;  %s31_s29 = ssub.s32 %s11845_s24, %s11919_s27 }
  0x11   : > { %p41_p0 = scmp.ne.s32.totalorder %s11841_s23, %s11837_s22  ;;  %p32_p1 = scmp.eq.s32.totalorder %s31_s29, 0 }
  0x12   : > { %p42_p2 = scmp.eq.s32.totalorder %s11845_s24, 0  ;;  %p47_p3 = scmp.ne.s32.totalorder %s11837_s22, %s11833_s21 }
  0x13   : > { %p12658_p4 = scmp.eq.s32.totalorder %s11915_s25, 0  ;;  %p186_p7 = scmp.eq.s32.totalorder %s11915_s25, 1 }
  0x14   : > { %s11931_s30 = scalar_select %p32_p1, %s11841_s23, %s34_s28  }
  0x15   : > { %p11933_p5 = por %p42_p2, %p41_p0  ;;  %p11939_p6 = por %p12658_p4, %p47_p3 }
  0x16   : > { %12689 = sst [smem:[#allocation22_spill]] %s11931_s30  ;;  %p192_p8 = scmp.eq.s32.totalorder %s9687_s26, 1 }
  0x17   : > { %s12690_s7 = scalar_select %p11933_p5, 1, 0 }
  0x18   : > { %s12691_s8 = scalar_select %p11939_p6, 1, 0 }
  0x19   : > { %p9688_p9 = scmp.ge.s32.totalorder %s11845_s24, 1  ;;  %p199_p10 = scmp.lt.s32.totalorder %s11845_s24, 3 }
  0x1a   : > { %p11946_p11 = por %p186_p7, %p41_p0  ;;  %p11950_p12 = por %p192_p8, %p47_p3 }
  0x1b   : > { %p11954_p13 = pnand %p9688_p9, %p199_p10  ;;  %s11847_s12 = smov [#allocation8]  }
  0x1c   : > { %s12692_s9 = scalar_select %p11946_p11, 1, 0 }
  0x1d   : > { %s12694_s10 = scalar_select %p11950_p12, 1, 0 }
  0x1e   : > { %12693 = sst [smem:[#allocation23_spill]] %s12692_s9  ;;  %p11513_p1 = pneg %p11954_p13 }
  0x1f   : > { %12695 = sst [smem:[#allocation24_spill]] %s12694_s10  ;;  %s211_s13 = sshll.u32 %s11847_s12, 4  ;;  %s212_s13 = int_to_ptr.vmem [resolvable:$true] %s211_s13 }
  0x20   : > { %s12696_s11 = scalar_select %p11954_p13, 1, 0 }
  0x21   : > { %p11962_p2 = pnand %p11513_p1, %p12658_p4  ;;  %s12662_s15 = sand.u32 1, %s11841_s23  }
  0x22   : > { %s11971_s16 = sshll.u32 %s12662_s15, 4  ;;  %s12698_s3 = sld [smem:[#allocation26_spill]] }
  0x23   : > { %s12697_s14 = scalar_select %p11962_p2, 1, 0 }
  0x24   : > { %p11981_p8 = pneg %p11962_p2 }
  0x26   : > { %s12699_s28 = scalar_select %p11981_p8, 1, 0 }
  0x28   : > { %s11593_s19 = scalar_lea.hbm %s12698_s3, 256 }
  0x29   : > { %p11594_p7 = scmp.ne.s32.totalorder %s12698_s3, %s11593_s19  ;;  %p11600_p1 = scmp.lt.u32.totalorder %s11593_s19, %s12698_s3 }
  0x2b   : > { %p11596_p9 = pnand %p11981_p8, %p11594_p7 }
  0x2d   : > { %p11597_p10 = pneg %p11596_p9 }
  0x2f   : > { %p11602_p0 = pnand %p11600_p1, %p11597_p10 }
  0x31   : > { %11605 = shalt.err (!%p11602_p0)
}
  0x32   : > { %s11606_s17 = scalar_lea.vmem %s212_s13, 256  ;;  %p11614_p11 = scmp.lt.s32.totalorder %s212_s13, %s212_s13 }
  0x33   : > { %p11607_p4 = scmp.ne.s32.totalorder %s212_s13, %s11606_s17  ;;  %p11615_p6 = scmp.lt.s32.totalorder %s11606_s17, %s11606_s17 }
  0x35   : > { %p11609_p3 = pnand %p11607_p4, %p11981_p8  ;;  %p11616_p13 = por %p11615_p6, %p11614_p11 }
  0x37   : > { %p11610_p12 = pneg %p11609_p3 }
  0x39   : > { %p11617_p5 = pnand %p11616_p13, %p11610_p12 }
  0x3b   : > { %11620 = shalt.err (!%p11617_p5)
}
  0x3c   : > { %s12665_s18 = smov 128   ;;  %s12667_s19 = smov 8  }
  0x3d   : > { %11516 = dma.hbm_to_vmem [thread:$0]  (!%p11962_p2), %s12698_s3, 256, %s212_s13, [#allocation9], %s12665_s18, %s12665_s18, %s12667_s19  }
  0x3e   : > { %s12001_s29 = sshll.u32 %s11845_s24, 8  ;;  %p12700_p4 = scmp.ne.s32.totalorder %s12690_s7, 0 }
  0x3f   : > { %p12701_p5 = scmp.lt.s32.totalorder %s11845_s24, 2  ;;  %s272_s17 = sand.u32 1, %s11845_s24  }
  0x40   : > { %s12703_s1 = sld [smem:[#allocation25_spill]]  ;;  %s276_s13 = scalar_lea.vmem [#allocation5], %s11971_s16 }
  0x41   : > { %p12007_p6 = pnand %p12701_p5, %p12700_p4  ;;  %s283_s20 = sshll.u32 %s276_s13, 4  ;;  %s12019_s20 = int_to_ptr.vmem [resolvable:$true] %s283_s20 }
  0x42   : > { %s12021_s7 = scalar_lea.sflag [#allocation6], %s272_s17 }
  0x43   : > { %s12702_s12 = scalar_select %p12007_p6, 1, 0 }
  0x44   : > { %p12027_p12 = pneg %p12007_p6 }
  0x46   : > { %s12016_s27 = scalar_lea.hbm %s12703_s1, %s12001_s29  ;;  %s11626_s19 = scalar_lea.hbm %s12703_s1, 512 }
  0x47   : > { %s11621_s26 = scalar_lea.hbm %s12016_s27, 256  ;;  %p11627_p3 = scmp.lt.u32.totalorder %s12016_s27, %s12703_s1 }
  0x48   : > { %p11622_p11 = scmp.ne.s32.totalorder %s12016_s27, %s11621_s26  ;;  %p11628_p7 = scmp.lt.u32.totalorder %s11626_s19, %s11621_s26 }
  0x49   : > { %s12704_s18 = scalar_select %p12027_p12, 1, 0 }
  0x4a   : > { %p11624_p13 = pnand %p12027_p12, %p11622_p11  ;;  %p11629_p9 = por %p11628_p7, %p11627_p3 }
  0x4b   : > { %p11630_p10 = scmp.lt.u32.totalorder %s11621_s26, %s12016_s27 }
  0x4c   : > { %p11625_p0 = pneg %p11624_p13 }
  0x4d   : > { %p11631_p1 = por %p11630_p10, %p11629_p9 }
  0x4f   : > { %p11632_p4 = pnand %p11631_p1, %p11625_p0 }
  0x51   : > { %11635 = shalt.err (!%p11632_p4)
}
  0x52   : > { %s11636_s17 = scalar_lea.vmem %s12019_s20, 256  ;;  %s11850_s30 = smov [#allocation5]  }
  0x53   : > { %p11637_p5 = scmp.ne.s32.totalorder %s12019_s20, %s11636_s17  ;;  %s11641_s15 = sshll.u32 %s11850_s30, 4  ;;  %s11642_s15 = int_to_ptr.vmem [resolvable:$false] %s11641_s15 }
  0x54   : > { %s11643_s3 = scalar_lea.vmem %s11642_s15, 512  ;;  %p11644_p2 = scmp.lt.s32.totalorder %s12019_s20, %s11642_s15 }
  0x55   : > { %p11639_p11 = pnand %p11637_p5, %p12027_p12  ;;  %p11645_p8 = scmp.lt.s32.totalorder %s11643_s3, %s11636_s17 }
  0x57   : > { %p11640_p13 = pneg %p11639_p11  ;;  %p11646_p3 = por %p11645_p8, %p11644_p2 }
  0x59   : > { %p11647_p7 = pnand %p11646_p3, %p11640_p13 }
  0x5b   : > { %11650 = shalt.err (!%p11647_p7)
}
  0x5c   : > { %s12705_s19 = smov 8   ;;  %s12706_s26 = smov 128  }
  0x5d   : > { %11529 = dma.hbm_to_vmem [thread:$0]  (!%p12007_p6), %s12016_s27, 256, %s12019_s20, %s12021_s7, %s12706_s26, %s12706_s26, %s12705_s19  }
  0x5e   : > { %s11851_s13 = smov [#allocation10]   ;;  %s11852_s30 = smov [#allocation11]  }
  0x5f   : > { %s224_s1 = sshll.u32 %s11851_s13, 4  ;;  %s237_s24 = sshll.u32 %s11852_s30, 4  ;;  %s225_s1 = int_to_ptr.vmem [resolvable:$true] %s224_s1  ;;  %s238_s24 = int_to_ptr.vmem [resolvable:$true] %s237_s24 }
  0x60   : > { %s11651_s3 = scalar_lea.hbm %s12655_s4, 256  ;;  %p12707_p8 = scmp.ne.s32.totalorder %s12699_s28, 0 }
  0x61   : > { %p11652_p2 = scmp.ne.s32.totalorder %s12655_s4, %s11651_s3  ;;  %p11658_p10 = scmp.lt.u32.totalorder %s11651_s3, %s12655_s4 }
  0x63   : > { %p11654_p0 = pnand %p11652_p2, %p12707_p8 }
  0x65   : > { %p11655_p9 = pneg %p11654_p0 }
  0x67   : > { %p11660_p1 = pnand %p11658_p10, %p11655_p9 }
  0x69   : > { %11663 = shalt.err (!%p11660_p1)
}
  0x6a   : > { %s11664_s27 = scalar_lea.vmem %s225_s1, 256  ;;  %p11672_p13 = scmp.lt.s32.totalorder %s225_s1, %s225_s1 }
  0x6b   : > { %p11665_p4 = scmp.ne.s32.totalorder %s225_s1, %s11664_s27  ;;  %p11673_p3 = scmp.lt.s32.totalorder %s11664_s27, %s11664_s27 }
  0x6d   : > { %p11667_p5 = pnand %p11665_p4, %p12707_p8  ;;  %p11674_p7 = por %p11673_p3, %p11672_p13 }
  0x6f   : > { %p11668_p11 = pneg %p11667_p5 }
  0x71   : > { %p11675_p6 = pnand %p11674_p7, %p11668_p11 }
  0x73   : > { %11678 = shalt.err (!%p11675_p6)
}
  0x74   : > { %p12708_p2 = scmp.ne.s32.totalorder %s12697_s14, 0  ;;  %s11679_s20 = scalar_lea.hbm %s12656_s5, 256 }
  0x75   : > { %p11680_p0 = scmp.ne.s32.totalorder %s12656_s5, %s11679_s20  ;;  %p11686_p10 = scmp.lt.u32.totalorder %s11679_s20, %s12656_s5 }
  0x76   : > { %11519 = dma.hbm_to_vmem [thread:$0]  (!%p12708_p2), %s12655_s4, 256, %s225_s1, [#allocation9], %s12706_s26, %s12706_s26, %s12705_s19  }
  0x77   : > { %p11682_p6 = pnand %p11680_p0, %p12707_p8 }
  0x79   : > { %p11683_p9 = pneg %p11682_p6 }
  0x7b   : > { %p11688_p1 = pnand %p11686_p10, %p11683_p9 }
  0x7d   : > { %11691 = shalt.err (!%p11688_p1)
}
  0x7e   : > { %s11692_s3 = scalar_lea.vmem %s238_s24, 256  ;;  %p11700_p13 = scmp.lt.s32.totalorder %s238_s24, %s238_s24 }
  0x7f   : > { %p11693_p4 = scmp.ne.s32.totalorder %s238_s24, %s11692_s3  ;;  %p11701_p3 = scmp.lt.s32.totalorder %s11692_s3, %s11692_s3 }
  0x81   : > { %p11695_p5 = pnand %p11693_p4, %p12707_p8  ;;  %p11702_p7 = por %p11701_p3, %p11700_p13 }
  0x83   : > { %p11696_p11 = pneg %p11695_p5 }
  0x85   : > { %p11703_p12 = pnand %p11702_p7, %p11696_p11 }
  0x87   : > { %11706 = shalt.err (!%p11703_p12)
}
  0x88   : > { %11522 = dma.hbm_to_vmem [thread:$0]  (!%p12708_p2), %s12656_s5, 256, %s238_s24, [#allocation12], %s12706_s26, %s12706_s26, %s12705_s19  }
  0x89   : > { %s12100_s21 = scalar_lea.hbm %s12651_s0, %s12001_s29  ;;  %s255_s14 = scalar_lea.vmem [#allocation2], %s11971_s16 }
  0x8a   : > { %s262_s9 = sshll.u32 %s255_s14, 4  ;;  %s12109_s13 = scalar_lea.hbm %s12653_s2, %s12001_s29  ;;  %s12103_s9 = int_to_ptr.vmem [resolvable:$true] %s262_s9 }
  0x8b   : > { %s12709_s30 = sand.u32 1, %s11841_s23   ;;  %s11707_s15 = scalar_lea.hbm %s12100_s21, 256 }
  0x8c   : > { %s12113_s24 = scalar_lea.sflag [#allocation3], %s12709_s30  ;;  %p11708_p12 = scmp.ne.s32.totalorder %s12100_s21, %s11707_s15 }
  0x8d   : > { %p12710_p8 = scmp.ne.s32.totalorder %s12704_s18, 0  ;;  %s11712_s1 = scalar_lea.hbm %s12651_s0, 512 }
  0x8e   : > { %p11713_p6 = scmp.lt.u32.totalorder %s12100_s21, %s12651_s0  ;;  %p11714_p9 = scmp.lt.u32.totalorder %s11712_s1, %s11707_s15 }
  0x8f   : > { %p11710_p2 = pnand %p11708_p12, %p12710_p8  ;;  %p11716_p1 = scmp.lt.u32.totalorder %s11707_s15, %s12100_s21 }
  0x90   : > { %p11715_p10 = por %p11714_p9, %p11713_p6 }
  0x91   : > { %p11711_p0 = pneg %p11710_p2 }
  0x92   : > { %p11717_p4 = por %p11716_p1, %p11715_p10 }
  0x94   : > { %p11718_p5 = pnand %p11717_p4, %p11711_p0 }
  0x96   : > { %11721 = shalt.err (!%p11718_p5)
}
  0x97   : > { %s11722_s29 = scalar_lea.vmem %s12103_s9, 256  ;;  %s11853_s6 = smov [#allocation2]  }
  0x98   : > { %p11723_p11 = scmp.ne.s32.totalorder %s12103_s9, %s11722_s29  ;;  %s11727_s14 = sshll.u32 %s11853_s6, 4  ;;  %s11728_s14 = int_to_ptr.vmem [resolvable:$false] %s11727_s14 }
  0x99   : > { %s11729_s10 = scalar_lea.vmem %s11728_s14, 512  ;;  %p11730_p7 = scmp.lt.s32.totalorder %s12103_s9, %s11728_s14 }
  0x9a   : > { %p11725_p13 = pnand %p11723_p11, %p12710_p8  ;;  %p11731_p12 = scmp.lt.s32.totalorder %s11729_s10, %s11722_s29 }
  0x9c   : > { %p11726_p3 = pneg %p11725_p13  ;;  %p11732_p2 = por %p11731_p12, %p11730_p7 }
  0x9e   : > { %p11733_p6 = pnand %p11732_p2, %p11726_p3 }
  0xa0   : > { %11736 = shalt.err (!%p11733_p6)
}
  0xa1   : > { %p12711_p0 = scmp.ne.s32.totalorder %s12702_s12, 0  ;;  %s297_s20 = scalar_lea.vmem [#allocation7], %s11971_s16 }
  0xa2   : > { %s304_s30 = sshll.u32 %s297_s20, 4  ;;  %s11737_s15 = scalar_lea.hbm %s12109_s13, 256  ;;  %s12141_s30 = int_to_ptr.vmem [resolvable:$true] %s304_s30 }
  0xa3   : > { %11526 = dma.hbm_to_vmem [thread:$0]  (!%p12711_p0), %s12100_s21, 256, %s12103_s9, %s12113_s24, %s12706_s26, %s12706_s26, %s12705_s19  }
  0xa4   : > { %p11738_p9 = scmp.ne.s32.totalorder %s12109_s13, %s11737_s15  ;;  %s11742_s1 = scalar_lea.hbm %s12653_s2, 512 }
  0xa5   : > { %p11743_p4 = scmp.lt.u32.totalorder %s12109_s13, %s12653_s2  ;;  %p11744_p5 = scmp.lt.u32.totalorder %s11742_s1, %s11737_s15 }
  0xa6   : > { %p11740_p10 = pnand %p11738_p9, %p12710_p8  ;;  %p11746_p13 = scmp.lt.u32.totalorder %s11737_s15, %s12109_s13 }
  0xa7   : > { %p11745_p11 = por %p11744_p5, %p11743_p4 }
  0xa8   : > { %p11741_p1 = pneg %p11740_p10 }
  0xa9   : > { %p11747_p3 = por %p11746_p13, %p11745_p11 }
  0xab   : > { %p11748_p7 = pnand %p11747_p3, %p11741_p1 }
  0xad   : > { %11751 = shalt.err (!%p11748_p7)
}
  0xae   : > { %s11752_s16 = scalar_lea.vmem %s12141_s30, 256  ;;  %s11854_s21 = smov [#allocation7]  }
  0xaf   : > { %p11753_p12 = scmp.ne.s32.totalorder %s12141_s30, %s11752_s16  ;;  %s11757_s9 = sshll.u32 %s11854_s21, 4  ;;  %s11758_s9 = int_to_ptr.vmem [resolvable:$false] %s11757_s9 }
  0xb0   : > { %s11759_s24 = scalar_lea.vmem %s11758_s9, 512  ;;  %p11760_p9 = scmp.lt.s32.totalorder %s12141_s30, %s11758_s9 }
  0xb1   : > { %p11755_p2 = pnand %p11753_p12, %p12710_p8  ;;  %p11761_p10 = scmp.lt.s32.totalorder %s11759_s24, %s11752_s16 }
  0xb3   : > { %p11756_p6 = pneg %p11755_p2  ;;  %p11762_p4 = por %p11761_p10, %p11760_p9 }
  0xb5   : > { %p11763_p5 = pnand %p11762_p4, %p11756_p6 }
  0xb7   : > { %11766 = shalt.err (!%p11763_p5)
}
  0xb8   : > { %11532 = dma.hbm_to_vmem [thread:$0]  (!%p12711_p0), %s12109_s13, 256, %s12141_s30, %s12021_s7, %s12706_s26, %s12706_s26, %s12705_s19  }
  0xb9   : > { %p12712_p8 = scmp.ne.s32.totalorder %s12696_s11, 0 }
  0xba   : > { %s12171_s18 = sand.u32 (!%p12712_p8), 1, %s11837_s22   ;;  %p12713_p1 = scmp.ne.s32.totalorder (!%p12712_p8), %s12691_s8, 0 }
  0xbb   : > { %316 = sbr.rel (%p12712_p8) target bundleno = 1634 (0x662), region = 44  ;;  %s12174_s29 = sshll.u32 (!%p12712_p8), %s12171_s18, 4 }
  0xbc   : > { %s319_s12 = scalar_lea.sflag (!%p12712_p8), [#allocation3], %s12171_s18  ;;  %s322_s6 = scalar_lea.vmem (!%p12712_p8), [#allocation2], %s12174_s29 }
  0xc2   : > { %11812 = dma.done.wait (%p12713_p1), %s319_s12, 256  }
  0xc3   : > { %11814 = vsyncadd (%p12713_p1), %s319_s12, 4294967040  ;;  %s327_s11 = sand.u32 1, %s11915_s25   ;;  %s331_s19 = scalar_lea.vmem [#allocation5], %s12174_s29 }
  0xc4   : > { %s328_s7 = scalar_lea.sflag [#allocation6], %s327_s11 }
  0xc5   : > { %11816 = dma.done.wait (%p12713_p1), %s328_s7, 512  }
  0xc6   : > { %11818 = vsyncadd (%p12713_p1), %s328_s7, 4294966784  ;;  %s340_s26 = scalar_lea.vmem [#allocation7], %s12174_s29  ;;  %p12714_p0 = scmp.eq.s32.totalorder %s11915_s25, 0 }
  0xc8   : > { %11820 = dma.done.wait (%p12714_p0), [#allocation9], 512   ;;  %p12715_p11 = pmov %p12714_p0 }
  0xc9   : > { %p12716_p13 = pmov %p12714_p0 }
  0xca   : > { %11822 = vsyncadd (%p12715_p11), [#allocation9], 4294966784 }
  0xcb   : > { %11824 = dma.done.wait (%p12716_p13), [#allocation12], 256   ;;  %p12717_p3 = pmov %p12714_p0 }
  0xcc   : > { %vm399_vm0 = vcmask 130048   ;;  %v395_v0 = vld [vmem:[#allocation10] sm:$0xff]  ;;  %v396_v1 = vld [vmem:[#allocation10 + $0x8] sm:$0xff]  ;;  %vm11856_vm1 = vmmov 0   ;;  %s9709_s8 = sshll.u32 %s12171_s18, 1  ;;  %s12718_s13 = sld [smem:[#allocation23_spill]] }
  0xcd   : > { %11826 = vsyncadd (%p12717_p3), [#allocation12], 4294967040  ;;  %v12197_v2 = vld [vmem:[%s340_s26] sm:$0xff]  ;;  %v407_v3 = vand.u32 4294901760, %v395_v0  ;;  %v410_v4 = vand.u32 4294901760, %v396_v1  ;;  %v12201_v6 = vld [vmem:[%s340_s26 + $0x8] sm:$0xff] }
  0xce   : > { %v401_v5 = vsel %vm399_vm0, %v12197_v2, 0  ;;  %v404_v8 = vsel %vm399_vm0, %v12201_v6, 0  ;;  %v1418_v30 = vmul.f32 %v12197_v2, %v12197_v2  ;;  %v1419_v31 = vmul.f32 %v12201_v6, %v12201_v6  ;;  %v12240_v44 = vld [vmem:[%s322_s6] sm:$0xff]  ;;  %v12248_v46 = vld [vmem:[%s322_s6 + $0x8] sm:$0xff]  ;;  %s9711_s14 = sshll.u32 %s11915_s25, 5  ;;  %s390_s10 = scalar_lea.vmem [#allocation13], %s9709_s8 }
  0xcf   : > { %v473_v7 = vand.u32 4294901760, %v401_v5  ;;  %v12205_v9 = vpack.c.bf16 %v410_v4, %v407_v3  ;;  %v483_v10 = vand.u32 4294901760, %v404_v8  ;;  %v495_v11 = vsub.f32 %v395_v0, %v407_v3  ;;  %s9545_s20 = sshll.u32 %s390_s10, 4  ;;  %s12719_s17 = sld [smem:[#allocation27_spill]]  ;;  %s12608_s20 = int_to_ptr.vmem [resolvable:$true] %s9545_s20 }
  0xd0   : > { %v502_v12 = vsub.f32 %v396_v1, %v410_v4  ;;  %v1421_v32 = vsel %vm399_vm0, %v1418_v30, 0  ;;  %v1424_v34 = vsel %vm399_vm0, %v1419_v31, 0  ;;  %v2437_v45 = vsel %vm399_vm0, %v12240_v44, 0  ;;  %s9532_s25 = scalar_lea.sflag [#allocation4], %s12171_s18  ;;  %s11767_s1 = scalar_lea.vmem %s12608_s20, 32 }
  0xd1   : > { %v474_v13 = vsub.f32 %v401_v5, %v473_v7  ;;  %10894 = vmatprep.subr.bf16.mxu0 %v12205_v9  ;;  %v484_v14 = vsub.f32 %v404_v8, %v483_v10  ;;  %v496_v15 = vand.u32 4294901760, %v495_v11  ;;  %v1493_v33 = vand.u32 4294901760, %v1421_v32  ;;  %v393_v5 = vld [vmem:[#allocation8] sm:$0xff]  ;;  %p11768_p7 = scmp.ne.s32.totalorder %s12608_s20, %s11767_s1  ;;  %s11858_s27 = smov [#allocation13]  }
  0xd2   : > { %v503_v16 = vand.u32 4294901760, %v502_v12  ;;  %10896 = vmatpush3.bf16.msra.mxu0 %v12205_v9  ;;  %v12211_v28 = vpack.c.bf16 %v502_v12, %v495_v11  ;;  %v1503_v35 = vand.u32 4294901760, %v1424_v34  ;;  %v2509_v47 = vand.u32 4294901760, %v2437_v45  ;;  %p12720_p12 = scmp.ne.s32.totalorder %s12718_s13, 0  ;;  %s11771_s28 = sshll.u32 %s11858_s27, 4  ;;  %s11772_s28 = int_to_ptr.vmem [resolvable:$false] %s11771_s28 }
  0xd3   : > { %v475_v17 = vand.u32 4294901760, %v474_v13  ;;  %v485_v18 = vand.u32 4294901760, %v484_v14  ;;  %v497_v19 = vsub.f32 %v495_v11, %v496_v15  ;;  %v1494_v36 = vsub.f32 %v1421_v32, %v1493_v33  ;;  %s11773_s16 = scalar_lea.vmem %s11772_s28, 64  ;;  %p11774_p9 = scmp.lt.s32.totalorder %s12608_s20, %s11772_s28 }
  0xd4   : > { %v504_v20 = vsub.f32 %v502_v12, %v503_v16  ;;  %v12218_v29 = vpack.c.bf16 %v503_v16, %v496_v15  ;;  %v1504_v37 = vsub.f32 %v1424_v34, %v1503_v35  ;;  %v2440_v48 = vsel %vm399_vm0, %v12248_v46, 0  ;;  %p11769_p2 = pnand %p11768_p7, %p12720_p12  ;;  %p11775_p10 = scmp.lt.s32.totalorder %s11773_s16, %s11767_s1 }
  0xd5   : > { %v476_v21 = vsub.f32 %v474_v13, %v475_v17  ;;  %v486_v22 = vsub.f32 %v484_v14, %v485_v18  ;;  %v498_v23 = vand.u32 4294901760, %v497_v19  ;;  %v1495_v38 = vand.u32 4294901760, %v1494_v36  ;;  %s12606_s3 = scalar_lea.hbm %s12719_s17, %s9711_s14 }
  0xd6   : > { %v505_v24 = vand.u32 4294901760, %v504_v20  ;;  %v1505_v39 = vand.u32 4294901760, %v1504_v37  ;;  %v2519_v49 = vand.u32 4294901760, %v2440_v48  ;;  %v2510_v50 = vsub.f32 %v2437_v45, %v2509_v47  ;;  %p11770_p6 = pneg %p11769_p2  ;;  %p11776_p4 = por %p11775_p10, %p11774_p9 }
  0xd7   : > { %v477_v25 = vand.u32 4294901760, %v476_v21  ;;  %v487_v26 = vand.u32 4294901760, %v486_v22  ;;  %v1496_v40 = vsub.f32 %v1494_v36, %v1495_v38  ;;  %v3446_v58 = vmul.f32 %v12240_v44, %v12240_v44 }
  0xd8   : > { %v12209_v27 = vpack.c.bf16 %v505_v24, %v498_v23  ;;  %v1506_v41 = vsub.f32 %v1504_v37, %v1505_v39  ;;  %v2520_v51 = vsub.f32 %v2440_v48, %v2519_v49  ;;  %v2511_v52 = vand.u32 4294901760, %v2510_v50  ;;  %p11777_p5 = pnand %p11776_p4, %p11770_p6 }
  0xd9   : > { %10141 = vmatprep.mubr.f32.mxu0 %v477_v25  ;;  %v1497_v42 = vand.u32 4294901760, %v1496_v40  ;;  %v3447_v59 = vmul.f32 %v12248_v46, %v12248_v46  ;;  %v3449_v60 = vsel %vm399_vm0, %v3446_v58, 0  ;;  %v909_v8 = vsel %vm399_vm0, %v393_v5, 0 }
  0xda   : > { %10142 = vmatmul.mubr.f32.vlgmr.msra.gmra.mrb[0].mxu0 %v487_v26  ;;  %10898 = vmatprep.subr.bf16.mxu0 %v12209_v27  ;;  %v1507_v43 = vand.u32 4294901760, %v1506_v41  ;;  %v2521_v53 = vand.u32 4294901760, %v2520_v51  ;;  %v2512_v54 = vsub.f32 %v2510_v50, %v2511_v52  ;;  %v3521_v61 = vand.u32 4294901760, %v3449_v60 }
  0xdb   : > { %10900 = vmatpush3.bf16.msra.mxu0 %v12209_v27  ;;  %10148 = vmatprep.mubr.f32.mxu0 %v473_v7  ;;  %v3452_v62 = vsel %vm399_vm0, %v3447_v59, 0  ;;  %v4459_v19 = vmul.f32 %v12248_v46, %v12201_v6  ;;  %vm9527_vm2 = vcmask 1040384   ;;  %vm9529_vm3 = vcmask 1024  }
  0xdc   : > { %10902 = vmatprep.subr.bf16.mxu0 %v12211_v28  ;;  %v2522_v55 = vsub.f32 %v2520_v51, %v2521_v53  ;;  %v2513_v56 = vand.u32 4294901760, %v2512_v54  ;;  %v3531_v63 = vand.u32 4294901760, %v3452_v62  ;;  %v3522_v0 = vsub.f32 %v3449_v60, %v3521_v61 }
  0xdd   : > { %v4464_v22 = vsel %vm399_vm0, %v4459_v19, 0 }
  0xde   : > { %v2523_v57 = vand.u32 4294901760, %v2522_v55  ;;  %v3532_v1 = vsub.f32 %v3452_v62, %v3531_v63  ;;  %v3523_v3 = vand.u32 4294901760, %v3522_v0  ;;  %v4543_v23 = vand.u32 4294901760, %v4464_v22 }
  0xe0   : > { %v3533_v4 = vand.u32 4294901760, %v3532_v1  ;;  %v4544_v25 = vsub.f32 %v4464_v22, %v4543_v23 }
  0xe2   : > { %10149 = vmatmul.mubr.f32.vlgmr.msra.gmra.mrb[0].mxu0 %v483_v10  ;;  %v3534_v11 = vsub.f32 %v3532_v1, %v3533_v4  ;;  %v4545_v30 = vand.u32 4294901760, %v4544_v25 }
  0xe3   : > { %10904 = vmatpush3.bf16.msra.mxu0 %v12211_v28  ;;  %10155 = vmatprep.mubr.f32.mxu0 %v474_v13 }
  0xe4   : > { %10906 = vmatprep.subr.bf16.mxu0 %v12205_v9  ;;  %v3535_v15 = vand.u32 4294901760, %v3534_v11  ;;  %v4546_v32 = vsub.f32 %v4544_v25, %v4545_v30 }
  0xe6   : > { %v4547_v34 = vand.u32 4294901760, %v4546_v32 }
  0xea   : > { %10156 = vmatmul.mubr.f32.vlgmr.msra.gmra.mrb[0].mxu0 %v484_v14 }
  0xeb   : > { %10908 = vmatpush3.bf16.msra.mxu0 %v12205_v9  ;;  %10162 = vmatprep.mubr.f32.mxu0 %v475_v17 }
  0xec   : > { %10910 = vmatprep.subr.bf16.mxu0 %v12218_v29 }
  0xf2   : > { %10163 = vmatmul.mubr.f32.vlgmr.msra.gmra.mrb[0].mxu0 %v485_v18  ;;  %v4458_v18 = vmul.f32 %v12240_v44, %v12197_v2 }
  0xf3   : > { %10912 = vmatpush3.bf16.msra.mxu0 %v12218_v29  ;;  %10169 = vmatprep.mubr.f32.mxu0 %v473_v7 }
  0xf4   : > { %10914 = vmatprep.subr.bf16.mxu0 %v12205_v9  ;;  %v4461_v20 = vsel %vm399_vm0, %v4458_v18, 0 }
  0xf5   : > { %v4533_v21 = vand.u32 4294901760, %v4461_v20 }
  0xf7   : > { %v4534_v24 = vsub.f32 %v4461_v20, %v4533_v21 }
  0xf9   : > { %v4535_v26 = vand.u32 4294901760, %v4534_v24 }
  0xfa   : > { %10170 = vmatmul.mubr.f32.vlgmr.msra.gmra.mrb[0].mxu0 %v483_v10 }
  0xfb   : > { %10916 = vmatpush3.bf16.msra.mxu0 %v12205_v9  ;;  %10176 = vmatprep.mubr.f32.mxu0 %v473_v7  ;;  %v3524_v7 = vsub.f32 %v3522_v0, %v3523_v3  ;;  %v4536_v31 = vsub.f32 %v4534_v24, %v4535_v26 }
  0xfc   : > { %10942 = vmatprep.subr.bf16.mxu0 %v12205_v9 }
  0xfd   : > { %v3525_v13 = vand.u32 4294901760, %v3524_v7 }
 0x102   : > { %10177 = vmatmul.mubr.f32.vlgmr.msra.gmra.mrb[0].mxu0 %v483_v10  ;;  %v12275_v10 = vand.u32 4294901760, %v909_v8 }
 0x103   : > { %10944 = vmatpush3.bf16.msra.mxu0 %v12205_v9  ;;  %10225 = vmatprep.mubr.f32.mxu0 %v1497_v42 }
 0x104   : > { %10946 = vmatprep.subr.bf16.mxu0 %v12209_v27  ;;  %v12278_v12 = vsub.f32 %v909_v8, %v12275_v10 }
 0x106   : > { %10226 = vmatmul.mubr.f32.vlgmr.msra.gmra.mrb[2].mxu0 %v1507_v43  ;;  %v12281_v14 = vand.u32 4294901760, %v12278_v12 }
 0x107   : > { %10948 = vmatpush3.bf16.msra.mxu0 %v12209_v27  ;;  %10232 = vmatprep.mubr.f32.mxu0 %v1493_v33 }
 0x108   : > { %10950 = vmatprep.subr.bf16.mxu0 %v12211_v28  ;;  %v984_v16 = vsub.f32 %v12278_v12, %v12281_v14 }
 0x10a   : > { %v12287_v17 = vand.u32 4294901760, %v984_v16 }
 0x10c   : > { %10183 = vmatprep.mubr.f32.mxu1 %v12287_v17 }
 0x10e   : > { %10233 = vmatmul.mubr.f32.vlgmr.msra.gmra.mrb[2].mxu0 %v1503_v35 }
 0x10f   : > { %10952 = vmatpush3.bf16.msra.mxu0 %v12211_v28  ;;  %10239 = vmatprep.mubr.f32.mxu0 %v1494_v36 }
 0x110   : > { %10954 = vmatprep.subr.bf16.mxu0 %v12205_v9 }
 0x116   : > { %10240 = vmatmul.mubr.f32.vlgmr.msra.gmra.mrb[2].mxu0 %v1504_v37 }
 0x117   : > { %10956 = vmatpush3.bf16.msra.mxu0 %v12205_v9  ;;  %10246 = vmatprep.mubr.f32.mxu0 %v1495_v38 }
 0x118   : > { %10958 = vmatprep.subr.bf16.mxu0 %v12218_v29 }
 0x11e   : > { %10247 = vmatmul.mubr.f32.vlgmr.msra.gmra.mrb[2].mxu0 %v1505_v39 }
 0x11f   : > { %10960 = vmatpush3.bf16.msra.mxu0 %v12218_v29  ;;  %10253 = vmatprep.mubr.f32.mxu0 %v1493_v33 }
 0x120   : > { %10962 = vmatprep.subr.bf16.mxu0 %v12205_v9 }
 0x126   : > { %10254 = vmatmul.mubr.f32.vlgmr.msra.gmra.mrb[2].mxu0 %v1503_v35 }
 0x127   : > { %10964 = vmatpush3.bf16.msra.mxu0 %v12205_v9  ;;  %10260 = vmatprep.mubr.f32.mxu0 %v1493_v33  ;;  %v4537_v33 = vand.u32 4294901760, %v4536_v31 }
 0x128   : > { %10990 = vmatprep.subr.bf16.mxu0 %v12205_v9 }
 0x12e   : > { %10261 = vmatmul.mubr.f32.vlgmr.msra.gmra.mrb[2].mxu0 %v1503_v35  ;;  %v394_v35 = vld [vmem:[#allocation8 + $0x8] sm:$0xff] }
 0x12f   : > { %10992 = vmatpush3.bf16.msra.mxu0 %v12205_v9  ;;  %10309 = vmatprep.mubr.f32.mxu0 %v2513_v56  ;;  %v912_v36 = vsel %vm399_vm0, %v394_v35, 0 }
 0x130   : > { %10994 = vmatprep.subr.bf16.mxu0 %v12209_v27  ;;  %v12318_v37 = vand.u32 4294901760, %v912_v36 }
 0x132   : > { %10310 = vmatmul.mubr.f32.vlgmr.msra.gmra.mrb[4].mxu0 %v2523_v57  ;;  %v12321_v38 = vsub.f32 %v912_v36, %v12318_v37 }
 0x133   : > { %10996 = vmatpush3.bf16.msra.mxu0 %v12209_v27  ;;  %10316 = vmatprep.mubr.f32.mxu0 %v2509_v47 }
 0x134   : > { %10998 = vmatprep.subr.bf16.mxu0 %v12211_v28  ;;  %v12324_v39 = vand.u32 4294901760, %v12321_v38 }
 0x136   : > { %v994_v44 = vsub.f32 %v12321_v38, %v12324_v39 }
 0x13a   : > { %10317 = vmatmul.mubr.f32.vlgmr.msra.gmra.mrb[4].mxu0 %v2519_v49 }
 0x13b   : > { %11000 = vmatpush3.bf16.msra.mxu0 %v12211_v28  ;;  %10323 = vmatprep.mubr.f32.mxu0 %v2510_v50  ;;  %v12328_v50 = vand.u32 4294901760, %v994_v44 }
 0x13c   : > { %11002 = vmatprep.subr.bf16.mxu0 %v12205_v9 }
 0x142   : > { %10324 = vmatmul.mubr.f32.vlgmr.msra.gmra.mrb[4].mxu0 %v2520_v51 }
 0x143   : > { %11004 = vmatpush3.bf16.msra.mxu0 %v12205_v9  ;;  %10330 = vmatprep.mubr.f32.mxu0 %v2511_v52 }
 0x144   : > { %11006 = vmatprep.subr.bf16.mxu0 %v12218_v29 }
 0x14a   : > { %10331 = vmatmul.mubr.f32.vlgmr.msra.gmra.mrb[4].mxu0 %v2521_v53 }
 0x14b   : > { %11008 = vmatpush3.bf16.msra.mxu0 %v12218_v29  ;;  %10337 = vmatprep.mubr.f32.mxu0 %v2509_v47 }
 0x14c   : > { %11010 = vmatprep.subr.bf16.mxu0 %v12205_v9 }
 0x152   : > { %10338 = vmatmul.mubr.f32.vlgmr.msra.gmra.mrb[4].mxu0 %v2519_v49 }
 0x153   : > { %11012 = vmatpush3.bf16.msra.mxu0 %v12205_v9  ;;  %10344 = vmatprep.mubr.f32.mxu0 %v2509_v47 }
 0x154   : > { %11038 = vmatprep.subr.bf16.mxu0 %v12205_v9 }
 0x15a   : > { %10345 = vmatmul.mubr.f32.vlgmr.msra.gmra.mrb[4].mxu0 %v2519_v49 }
 0x15b   : > { %11040 = vmatpush3.bf16.msra.mxu0 %v12205_v9  ;;  %10393 = vmatprep.mubr.f32.mxu0 %v3525_v13 }
 0x15c   : > { %11042 = vmatprep.subr.bf16.mxu0 %v12209_v27 }
 0x15e   : > { %10394 = vmatmul.mubr.f32.vlgmr.msra.gmra.mrb[6].mxu0 %v3535_v15 }
 0x15f   : > { %11044 = vmatpush3.bf16.msra.mxu0 %v12209_v27  ;;  %10400 = vmatprep.mubr.f32.mxu0 %v3521_v61 }
 0x160   : > { %11046 = vmatprep.subr.bf16.mxu0 %v12211_v28 }
 0x166   : > { %10401 = vmatmul.mubr.f32.vlgmr.msra.gmra.mrb[6].mxu0 %v3531_v63 }
 0x167   : > { %11048 = vmatpush3.bf16.msra.mxu0 %v12211_v28  ;;  %10407 = vmatprep.mubr.f32.mxu0 %v3522_v0 }
 0x168   : > { %11050 = vmatprep.subr.bf16.mxu0 %v12205_v9 }
 0x16e   : > { %10408 = vmatmul.mubr.f32.vlgmr.msra.gmra.mrb[6].mxu0 %v3532_v1 }
 0x16f   : > { %11052 = vmatpush3.bf16.msra.mxu0 %v12205_v9  ;;  %10414 = vmatprep.mubr.f32.mxu0 %v3523_v3 }
 0x170   : > { %11054 = vmatprep.subr.bf16.mxu0 %v12218_v29 }
 0x176   : > { %10415 = vmatmul.mubr.f32.vlgmr.msra.gmra.mrb[6].mxu0 %v3533_v4 }
 0x177   : > { %11056 = vmatpush3.bf16.msra.mxu0 %v12218_v29  ;;  %10421 = vmatprep.mubr.f32.mxu0 %v3521_v61 }
 0x178   : > { %11058 = vmatprep.subr.bf16.mxu0 %v12205_v9 }
 0x17e   : > { %10422 = vmatmul.mubr.f32.vlgmr.msra.gmra.mrb[6].mxu0 %v3531_v63 }
 0x17f   : > { %11060 = vmatpush3.bf16.msra.mxu0 %v12205_v9  ;;  %10428 = vmatprep.mubr.f32.mxu0 %v3521_v61 }
 0x180   : > { %11086 = vmatprep.subr.bf16.mxu0 %v12205_v9 }
 0x186   : > { %10429 = vmatmul.mubr.f32.vlgmr.msra.gmra.mrb[6].mxu0 %v3531_v63 }
 0x187   : > { %11088 = vmatpush3.bf16.msra.mxu0 %v12205_v9  ;;  %10477 = vmatprep.mubr.f32.mxu0 %v4537_v33 }
 0x188   : > { %11090 = vmatprep.subr.bf16.mxu0 %v12209_v27 }
 0x18a   : > { %10478 = vmatmul.mubr.f32.vlgmr.msra.gmra.mrb[8].mxu0 %v4547_v34 }
 0x18b   : > { %11092 = vmatpush3.bf16.msra.mxu0 %v12209_v27  ;;  %10484 = vmatprep.mubr.f32.mxu0 %v4533_v21 }
 0x18c   : > { %11094 = vmatprep.subr.bf16.mxu0 %v12211_v28 }
 0x192   : > { %10485 = vmatmul.mubr.f32.vlgmr.msra.gmra.mrb[8].mxu0 %v4543_v23 }
 0x193   : > { %11096 = vmatpush3.bf16.msra.mxu0 %v12211_v28  ;;  %10491 = vmatprep.mubr.f32.mxu0 %v4534_v24 }
 0x194   : > { %11098 = vmatprep.subr.bf16.mxu0 %v12205_v9 }
 0x19a   : > { %10492 = vmatmul.mubr.f32.vlgmr.msra.gmra.mrb[8].mxu0 %v4544_v25 }
 0x19b   : > { %11100 = vmatpush3.bf16.msra.mxu0 %v12205_v9  ;;  %10498 = vmatprep.mubr.f32.mxu0 %v4535_v26 }
 0x19c   : > { %11102 = vmatprep.subr.bf16.mxu0 %v12218_v29 }
 0x1a2   : > { %10499 = vmatmul.mubr.f32.vlgmr.msra.gmra.mrb[8].mxu0 %v4545_v30 }
 0x1a3   : > { %11104 = vmatpush3.bf16.msra.mxu0 %v12218_v29  ;;  %10505 = vmatprep.mubr.f32.mxu0 %v4533_v21 }
 0x1a4   : > { %11106 = vmatprep.subr.bf16.mxu0 %v12205_v9 }
 0x1aa   : > { %10506 = vmatmul.mubr.f32.vlgmr.msra.gmra.mrb[8].mxu0 %v4543_v23 }
 0x1ab   : > { %11108 = vmatpush3.bf16.msra.mxu0 %v12205_v9  ;;  %10512 = vmatprep.mubr.f32.mxu0 %v4533_v21 }
 0x1b2   : > { %10513 = vmatmul.mubr.f32.vlgmr.msra.gmra.mrb[8].mxu0 %v4543_v23 }
 0x1d5   : > { %v10178_v40 = vpop.f32.mrb[0].mxu0 }
 0x1d6   : > { %v918_v41 = vand.u32 4294901760, %v10178_v40  ;;  %v898_v42 = vpop.f32.mrb[1].mxu0 }
 0x1d7   : > { %v915_v43 = vand.u32 4294901760, %v898_v42 }
 0x1d8   : > { %v1010_v45 = vsub.f32 %v10178_v40, %v918_v41 }
 0x1d9   : > { %v10917_v46 = vpack.c.bf16 %v918_v41, %v915_v43  ;;  %v1003_v47 = vsub.f32 %v898_v42, %v915_v43 }
 0x1da   : > { %v1011_v48 = vand.u32 4294901760, %v1010_v45 }
 0x1db   : > { %v1004_v49 = vand.u32 4294901760, %v1003_v47  ;;  %10918 = vmatprep.subr.bf16.mxu1 %v10917_v46  ;;  %v10925_v51 = vpack.c.bf16 %v1010_v45, %v1003_v47 }
 0x1dc   : > { %v1012_v52 = vsub.f32 %v1010_v45, %v1011_v48  ;;  %10920 = vmatpush3.bf16.msra.mxu1 %v10917_v46 }
 0x1dd   : > { %v1005_v53 = vsub.f32 %v1003_v47, %v1004_v49  ;;  %v10933_v54 = vpack.c.bf16 %v1011_v48, %v1004_v49 }
 0x1de   : > { %v1013_v55 = vand.u32 4294901760, %v1012_v52 }
 0x1df   : > { %10184 = vmatmul.mubr.f32.vlgmr.msra.gmra.mrb[0].mxu1 %v12328_v50  ;;  %v1006_v56 = vand.u32 4294901760, %v1005_v53 }
 0x1e0   : > { %10190 = vmatprep.mubr.f32.mxu1 %v12275_v10 }
 0x1e1   : > { %v10921_v57 = vpack.c.bf16 %v1013_v55, %v1006_v56 }
 0x1e3   : > { %10922 = vmatprep.subr.bf16.mxu1 %v10921_v57 }
 0x1e4   : > { %10924 = vmatpush3.bf16.msra.mxu1 %v10921_v57 }
 0x1e5   : > { %10926 = vmatprep.subr.bf16.mxu1 %v10925_v51 }
 0x1e7   : > { %10191 = vmatmul.mubr.f32.vlgmr.msra.gmra.mrb[0].mxu1 %v12318_v37 }
 0x1e8   : > { %10928 = vmatpush3.bf16.msra.mxu1 %v10925_v51  ;;  %10197 = vmatprep.mubr.f32.mxu1 %v12278_v12 }
 0x1e9   : > { %10930 = vmatprep.subr.bf16.mxu1 %v10917_v46 }
 0x1ef   : > { %10198 = vmatmul.mubr.f32.vlgmr.msra.gmra.mrb[0].mxu1 %v12321_v38 }
 0x1f0   : > { %10932 = vmatpush3.bf16.msra.mxu1 %v10917_v46  ;;  %10204 = vmatprep.mubr.f32.mxu1 %v12281_v14 }
 0x1f1   : > { %10934 = vmatprep.subr.bf16.mxu1 %v10933_v54 }
 0x1f7   : > { %10205 = vmatmul.mubr.f32.vlgmr.msra.gmra.mrb[0].mxu1 %v12324_v39 }
 0x1f8   : > { %10936 = vmatpush3.bf16.msra.mxu1 %v10933_v54  ;;  %10211 = vmatprep.mubr.f32.mxu1 %v12275_v10 }
 0x1f9   : > { %10938 = vmatprep.subr.bf16.mxu1 %v10917_v46 }
 0x1ff   : > { %10212 = vmatmul.mubr.f32.vlgmr.msra.gmra.mrb[0].mxu1 %v12318_v37 }
 0x200   : > { %10940 = vmatpush3.bf16.msra.mxu1 %v10917_v46  ;;  %10218 = vmatprep.mubr.f32.mxu1 %v12275_v10 }
 0x201   : > { %v10262_v58 = vpop.f32.mrb[2].mxu0 }
 0x202   : > { %v1932_v59 = vand.u32 4294901760, %v10262_v58  ;;  %v1918_v60 = vpop.f32.mrb[3].mxu0 }
 0x203   : > { %v1929_v61 = vand.u32 4294901760, %v1918_v60 }
 0x204   : > { %v2024_v62 = vsub.f32 %v10262_v58, %v1932_v59 }
 0x205   : > { %v10965_v63 = vpack.c.bf16 %v1932_v59, %v1929_v61  ;;  %v2017_v0 = vsub.f32 %v1918_v60, %v1929_v61 }
 0x206   : > { %v2025_v1 = vand.u32 4294901760, %v2024_v62 }
 0x207   : > { %v2018_v3 = vand.u32 4294901760, %v2017_v0  ;;  %10219 = vmatmul.mubr.f32.vlgmr.msra.gmra.mrb[0].mxu1 %v12318_v37  ;;  %10966 = vmatprep.subr.bf16.mxu1 %v10965_v63  ;;  %v10973_v4 = vpack.c.bf16 %v2024_v62, %v2017_v0 }
 0x208   : > { %v2026_v5 = vsub.f32 %v2024_v62, %v2025_v1  ;;  %10968 = vmatpush3.bf16.msra.mxu1 %v10965_v63  ;;  %10267 = vmatprep.mubr.f32.mxu1 %v12287_v17 }
 0x209   : > { %v2019_v7 = vsub.f32 %v2017_v0, %v2018_v3  ;;  %v10981_v8 = vpack.c.bf16 %v2025_v1, %v2018_v3 }
 0x20a   : > { %v2027_v11 = vand.u32 4294901760, %v2026_v5 }
 0x20b   : > { %10268 = vmatmul.mubr.f32.vlgmr.msra.gmra.mrb[2].mxu1 %v12328_v50  ;;  %v2020_v13 = vand.u32 4294901760, %v2019_v7 }
 0x20c   : > { %10274 = vmatprep.mubr.f32.mxu1 %v12275_v10 }
 0x20d   : > { %v10969_v15 = vpack.c.bf16 %v2027_v11, %v2020_v13  ;;  %v12384_v13 = vld [vmem:[%s331_s19] sm:$0xff] }
 0x20f   : > { %10970 = vmatprep.subr.bf16.mxu1 %v10969_v15 }
 0x210   : > { %10972 = vmatpush3.bf16.msra.mxu1 %v10969_v15  ;;  %v5982_v15 = vsel %vm399_vm0, %v12384_v13, 0 }
 0x211   : > { %10974 = vmatprep.subr.bf16.mxu1 %v10973_v4 }
 0x213   : > { %10275 = vmatmul.mubr.f32.vlgmr.msra.gmra.mrb[2].mxu1 %v12318_v37 }
 0x214   : > { %10976 = vmatpush3.bf16.msra.mxu1 %v10973_v4  ;;  %10281 = vmatprep.mubr.f32.mxu1 %v12278_v12 }
 0x215   : > { %10978 = vmatprep.subr.bf16.mxu1 %v10965_v63 }
 0x21b   : > { %10282 = vmatmul.mubr.f32.vlgmr.msra.gmra.mrb[2].mxu1 %v12321_v38 }
 0x21c   : > { %10980 = vmatpush3.bf16.msra.mxu1 %v10965_v63  ;;  %10288 = vmatprep.mubr.f32.mxu1 %v12281_v14 }
 0x21d   : > { %10982 = vmatprep.subr.bf16.mxu1 %v10981_v8 }
 0x223   : > { %10289 = vmatmul.mubr.f32.vlgmr.msra.gmra.mrb[2].mxu1 %v12324_v39 }
 0x224   : > { %10984 = vmatpush3.bf16.msra.mxu1 %v10981_v8  ;;  %10295 = vmatprep.mubr.f32.mxu1 %v12275_v10 }
 0x225   : > { %10986 = vmatprep.subr.bf16.mxu1 %v10965_v63 }
 0x22b   : > { %10296 = vmatmul.mubr.f32.vlgmr.msra.gmra.mrb[2].mxu1 %v12318_v37 }
 0x22c   : > { %10988 = vmatpush3.bf16.msra.mxu1 %v10965_v63  ;;  %10302 = vmatprep.mubr.f32.mxu1 %v12275_v10 }
 0x22d   : > { %v10346_v16 = vpop.f32.mrb[4].mxu0 }
 0x22e   : > { %v2948_v18 = vand.u32 4294901760, %v10346_v16  ;;  %v2934_v19 = vpop.f32.mrb[5].mxu0 }
 0x22f   : > { %v2945_v20 = vand.u32 4294901760, %v2934_v19 }
 0x230   : > { %v3040_v21 = vsub.f32 %v10346_v16, %v2948_v18  ;;  %v12392_v16 = vld [vmem:[%s331_s19 + $0x8] sm:$0xff] }
 0x231   : > { %v11013_v22 = vpack.c.bf16 %v2948_v18, %v2945_v20  ;;  %v3033_v23 = vsub.f32 %v2934_v19, %v2945_v20  ;;  %v6054_v18 = vand.u32 4294901760, %v5982_v15  ;;  %v5985_v19 = vsel %vm399_vm0, %v12392_v16, 0 }
 0x232   : > { %v3041_v24 = vand.u32 4294901760, %v3040_v21  ;;  %v6064_v20 = vand.u32 4294901760, %v5985_v19 }
 0x233   : > { %v3034_v25 = vand.u32 4294901760, %v3033_v23  ;;  %10303 = vmatmul.mubr.f32.vlgmr.msra.gmra.mrb[2].mxu1 %v12318_v37  ;;  %11014 = vmatprep.subr.bf16.mxu1 %v11013_v22  ;;  %v11021_v26 = vpack.c.bf16 %v3040_v21, %v3033_v23 }
 0x234   : > { %v3042_v30 = vsub.f32 %v3040_v21, %v3041_v24  ;;  %11016 = vmatpush3.bf16.msra.mxu1 %v11013_v22  ;;  %10351 = vmatprep.mubr.f32.mxu1 %v12287_v17  ;;  %v6055_v21 = vsub.f32 %v5982_v15, %v6054_v18 }
 0x235   : > { %v3035_v31 = vsub.f32 %v3033_v23, %v3034_v25  ;;  %v11029_v32 = vpack.c.bf16 %v3041_v24, %v3034_v25 }
 0x236   : > { %v3043_v33 = vand.u32 4294901760, %v3042_v30  ;;  %v6056_v23 = vand.u32 4294901760, %v6055_v21 }
 0x237   : > { %10352 = vmatmul.mubr.f32.vlgmr.msra.gmra.mrb[4].mxu1 %v12328_v50  ;;  %v3036_v34 = vand.u32 4294901760, %v3035_v31 }
 0x238   : > { %10358 = vmatprep.mubr.f32.mxu1 %v12275_v10  ;;  %v6057_v25 = vsub.f32 %v6055_v21, %v6056_v23 }
 0x239   : > { %v11017_v35 = vpack.c.bf16 %v3043_v33, %v3036_v34  ;;  %v6992_v33 = vmul.f32 %v12392_v16, %v12392_v16 }
 0x23a   : > { %v6058_v30 = vand.u32 4294901760, %v6057_v25 }
 0x23b   : > { %11018 = vmatprep.subr.bf16.mxu1 %v11017_v35 }
 0x23c   : > { %11020 = vmatpush3.bf16.msra.mxu1 %v11017_v35 }
 0x23d   : > { %11022 = vmatprep.subr.bf16.mxu1 %v11021_v26 }
 0x23f   : > { %10359 = vmatmul.mubr.f32.vlgmr.msra.gmra.mrb[4].mxu1 %v12318_v37 }
 0x240   : > { %11024 = vmatpush3.bf16.msra.mxu1 %v11021_v26  ;;  %10365 = vmatprep.mubr.f32.mxu1 %v12278_v12 }
 0x241   : > { %11026 = vmatprep.subr.bf16.mxu1 %v11013_v22 }
 0x247   : > { %10366 = vmatmul.mubr.f32.vlgmr.msra.gmra.mrb[4].mxu1 %v12321_v38 }
 0x248   : > { %11028 = vmatpush3.bf16.msra.mxu1 %v11013_v22  ;;  %10372 = vmatprep.mubr.f32.mxu1 %v12281_v14 }
 0x249   : > { %11030 = vmatprep.subr.bf16.mxu1 %v11029_v32 }
 0x24f   : > { %10373 = vmatmul.mubr.f32.vlgmr.msra.gmra.mrb[4].mxu1 %v12324_v39 }
 0x250   : > { %11032 = vmatpush3.bf16.msra.mxu1 %v11029_v32  ;;  %10379 = vmatprep.mubr.f32.mxu1 %v12275_v10  ;;  %v6991_v32 = vmul.f32 %v12384_v13, %v12384_v13 }
 0x251   : > { %11034 = vmatprep.subr.bf16.mxu1 %v11013_v22 }
 0x252   : > { %v6994_v34 = vsel %vm399_vm0, %v6991_v32, 0 }
 0x253   : > { %v7066_v35 = vand.u32 4294901760, %v6994_v34 }
 0x257   : > { %10380 = vmatmul.mubr.f32.vlgmr.msra.gmra.mrb[4].mxu1 %v12318_v37 }
 0x258   : > { %11036 = vmatpush3.bf16.msra.mxu1 %v11013_v22  ;;  %10386 = vmatprep.mubr.f32.mxu1 %v12275_v10  ;;  %v6065_v22 = vsub.f32 %v5985_v19, %v6064_v20 }
 0x259   : > { %v10430_v36 = vpop.f32.mrb[6].mxu0 }
 0x25a   : > { %v3960_v40 = vand.u32 4294901760, %v10430_v36  ;;  %v3946_v41 = vpop.f32.mrb[7].mxu0  ;;  %v6066_v24 = vand.u32 4294901760, %v6065_v22 }
 0x25b   : > { %v3957_v42 = vand.u32 4294901760, %v3946_v41 }
 0x25c   : > { %v4052_v43 = vsub.f32 %v10430_v36, %v3960_v40  ;;  %v6067_v26 = vsub.f32 %v6065_v22, %v6066_v24  ;;  %v6997_v36 = vsel %vm399_vm0, %v6992_v33, 0 }
 0x25d   : > { %v11061_v44 = vpack.c.bf16 %v3960_v40, %v3957_v42  ;;  %v4045_v45 = vsub.f32 %v3946_v41, %v3957_v42  ;;  %v7076_v40 = vand.u32 4294901760, %v6997_v36  ;;  %v7067_v41 = vsub.f32 %v6994_v34, %v7066_v35 }
 0x25e   : > { %v4053_v46 = vand.u32 4294901760, %v4052_v43  ;;  %v6068_v31 = vand.u32 4294901760, %v6067_v26 }
 0x25f   : > { %v4046_v47 = vand.u32 4294901760, %v4045_v45  ;;  %10387 = vmatmul.mubr.f32.vlgmr.msra.gmra.mrb[4].mxu1 %v12318_v37  ;;  %11062 = vmatprep.subr.bf16.mxu1 %v11061_v44  ;;  %v11069_v48 = vpack.c.bf16 %v4052_v43, %v4045_v45  ;;  %v7077_v42 = vsub.f32 %v6997_v36, %v7076_v40 }
 0x260   : > { %v4054_v49 = vsub.f32 %v4052_v43, %v4053_v46  ;;  %11064 = vmatpush3.bf16.msra.mxu1 %v11061_v44  ;;  %10435 = vmatprep.mubr.f32.mxu1 %v12287_v17  ;;  %v7068_v43 = vand.u32 4294901760, %v7067_v41 }
 0x261   : > { %v4047_v51 = vsub.f32 %v4045_v45, %v4046_v47  ;;  %v11077_v52 = vpack.c.bf16 %v4053_v46, %v4046_v47  ;;  %v7078_v46 = vand.u32 4294901760, %v7077_v42 }
 0x262   : > { %v4055_v53 = vand.u32 4294901760, %v4054_v49  ;;  %v7069_v47 = vsub.f32 %v7067_v41, %v7068_v43 }
 0x263   : > { %10436 = vmatmul.mubr.f32.vlgmr.msra.gmra.mrb[6].mxu1 %v12328_v50  ;;  %v4048_v54 = vand.u32 4294901760, %v4047_v51 }
 0x264   : > { %10442 = vmatprep.mubr.f32.mxu1 %v12275_v10  ;;  %v7070_v49 = vand.u32 4294901760, %v7069_v47 }
 0x265   : > { %v11065_v55 = vpack.c.bf16 %v4055_v53, %v4048_v54  ;;  %v8004_v53 = vmul.f32 %v12392_v16, %v12201_v6 }
 0x267   : > { %11066 = vmatprep.subr.bf16.mxu1 %v11065_v55 }
 0x268   : > { %11068 = vmatpush3.bf16.msra.mxu1 %v11065_v55 }
 0x269   : > { %11070 = vmatprep.subr.bf16.mxu1 %v11069_v48 }
 0x26b   : > { %10443 = vmatmul.mubr.f32.vlgmr.msra.gmra.mrb[6].mxu1 %v12318_v37 }
 0x26c   : > { %11072 = vmatpush3.bf16.msra.mxu1 %v11069_v48  ;;  %10449 = vmatprep.mubr.f32.mxu1 %v12278_v12  ;;  %v7079_v48 = vsub.f32 %v7077_v42, %v7078_v46 }
 0x26d   : > { %11074 = vmatprep.subr.bf16.mxu1 %v11061_v44 }
 0x26e   : > { %v7080_v51 = vand.u32 4294901760, %v7079_v48 }
 0x273   : > { %10450 = vmatmul.mubr.f32.vlgmr.msra.gmra.mrb[6].mxu1 %v12321_v38 }
 0x274   : > { %11076 = vmatpush3.bf16.msra.mxu1 %v11061_v44  ;;  %10456 = vmatprep.mubr.f32.mxu1 %v12281_v14 }
 0x275   : > { %11078 = vmatprep.subr.bf16.mxu1 %v11077_v52 }
 0x27b   : > { %10457 = vmatmul.mubr.f32.vlgmr.msra.gmra.mrb[6].mxu1 %v12324_v39 }
 0x27c   : > { %11080 = vmatpush3.bf16.msra.mxu1 %v11077_v52  ;;  %10463 = vmatprep.mubr.f32.mxu1 %v12275_v10  ;;  %v8003_v52 = vmul.f32 %v12384_v13, %v12197_v2 }
 0x27d   : > { %11082 = vmatprep.subr.bf16.mxu1 %v11061_v44 }
 0x27e   : > { %v8006_v54 = vsel %vm399_vm0, %v8003_v52, 0 }
 0x27f   : > { %v12437_v55 = vand.u32 4294901760, %v8006_v54 }
 0x281   : > { %v8079_v2 = vsub.f32 %v8006_v54, %v12437_v55 }
 0x283   : > { %10464 = vmatmul.mubr.f32.vlgmr.msra.gmra.mrb[6].mxu1 %v12318_v37 }
 0x284   : > { %11084 = vmatpush3.bf16.msra.mxu1 %v11061_v44  ;;  %10470 = vmatprep.mubr.f32.mxu1 %v12275_v10 }
 0x285   : > { %v10514_v56 = vpop.f32.mrb[8].mxu0 }
 0x286   : > { %v4972_v57 = vand.u32 4294901760, %v10514_v56  ;;  %v4958_v58 = vpop.f32.mrb[9].mxu0 }
 0x287   : > { %v4969_v59 = vand.u32 4294901760, %v4958_v58 }
 0x288   : > { %v5064_v60 = vsub.f32 %v10514_v56, %v4972_v57  ;;  %v8009_v56 = vsel %vm399_vm0, %v8004_v53, 0 }
 0x289   : > { %v11109_v61 = vpack.c.bf16 %v4972_v57, %v4969_v59  ;;  %v5057_v62 = vsub.f32 %v4958_v58, %v4969_v59  ;;  %v12440_v57 = vand.u32 4294901760, %v8009_v56  ;;  %v8080_v58 = vand.u32 4294901760, %v8079_v2 }
 0x28a   : > { %v5065_v63 = vand.u32 4294901760, %v5064_v60 }
 0x28b   : > { %v5058_v0 = vand.u32 4294901760, %v5057_v62  ;;  %10471 = vmatmul.mubr.f32.vlgmr.msra.gmra.mrb[6].mxu1 %v12318_v37  ;;  %11110 = vmatprep.subr.bf16.mxu1 %v11109_v61  ;;  %v11117_v1 = vpack.c.bf16 %v5064_v60, %v5057_v62  ;;  %v8089_v6 = vsub.f32 %v8009_v56, %v12440_v57 }
 0x28c   : > { %v5066_v3 = vsub.f32 %v5064_v60, %v5065_v63  ;;  %11112 = vmatpush3.bf16.msra.mxu1 %v11109_v61  ;;  %10519 = vmatprep.mubr.f32.mxu1 %v12287_v17 }
 0x28d   : > { %v5059_v4 = vsub.f32 %v5057_v62, %v5058_v0  ;;  %v11125_v5 = vpack.c.bf16 %v5065_v63, %v5058_v0  ;;  %v8081_v62 = vsub.f32 %v8079_v2, %v8080_v58 }
 0x28e   : > { %v5067_v7 = vand.u32 4294901760, %v5066_v3  ;;  %v397_v3 = vld [vmem:[#allocation11] sm:$0xff] }
 0x28f   : > { %10520 = vmatmul.mubr.f32.vlgmr.msra.gmra.mrb[8].mxu1 %v12328_v50  ;;  %v5060_v8 = vand.u32 4294901760, %v5059_v4  ;;  %v8082_v0 = vand.u32 4294901760, %v8081_v62  ;;  %v398_v4 = vld [vmem:[#allocation11 + $0x8] sm:$0xff] }
 0x290   : > { %10526 = vmatprep.mubr.f32.mxu1 %v12275_v10 }
 0x291   : > { %v11113_v11 = vpack.c.bf16 %v5067_v7, %v5060_v8  ;;  %v5524_v7 = vand.u32 4294901760, %v398_v4 }
 0x293   : > { %11114 = vmatprep.subr.bf16.mxu1 %v11113_v11  ;;  %v5606_v13 = vsub.f32 %v398_v4, %v5524_v7 }
 0x294   : > { %11116 = vmatpush3.bf16.msra.mxu1 %v11113_v11 }
 0x295   : > { %11118 = vmatprep.subr.bf16.mxu1 %v11117_v1  ;;  %v5607_v16 = vand.u32 4294901760, %v5606_v13 }
 0x297   : > { %10527 = vmatmul.mubr.f32.vlgmr.msra.gmra.mrb[8].mxu1 %v12318_v37  ;;  %v5608_v19 = vsub.f32 %v5606_v13, %v5607_v16 }
 0x298   : > { %11120 = vmatpush3.bf16.msra.mxu1 %v11117_v1  ;;  %10533 = vmatprep.mubr.f32.mxu1 %v12278_v12 }
 0x299   : > { %11122 = vmatprep.subr.bf16.mxu1 %v11109_v61 }
 0x29f   : > { %10534 = vmatmul.mubr.f32.vlgmr.msra.gmra.mrb[8].mxu1 %v12321_v38 }
 0x2a0   : > { %11124 = vmatpush3.bf16.msra.mxu1 %v11109_v61  ;;  %10540 = vmatprep.mubr.f32.mxu1 %v12281_v14 }
 0x2a1   : > { %11126 = vmatprep.subr.bf16.mxu1 %v11125_v5 }
 0x2a7   : > { %10541 = vmatmul.mubr.f32.vlgmr.msra.gmra.mrb[8].mxu1 %v12324_v39 }
 0x2a8   : > { %11128 = vmatpush3.bf16.msra.mxu1 %v11125_v5  ;;  %10547 = vmatprep.mubr.f32.mxu1 %v12275_v10  ;;  %v5521_v5 = vand.u32 4294901760, %v397_v3 }
 0x2a9   : > { %11130 = vmatprep.subr.bf16.mxu1 %v11109_v61 }
 0x2aa   : > { %v12463_v8 = vpack.c.bf16 %v5524_v7, %v5521_v5  ;;  %v5599_v11 = vsub.f32 %v397_v3, %v5521_v5 }
 0x2ac   : > { %v5600_v15 = vand.u32 4294901760, %v5599_v11  ;;  %v12483_v33 = vpack.c.bf16 %v5606_v13, %v5599_v11 }
 0x2af   : > { %10548 = vmatmul.mubr.f32.vlgmr.msra.gmra.mrb[8].mxu1 %v12318_v37 }
 0x2b0   : > { %11132 = vmatpush3.bf16.msra.mxu1 %v11109_v61  ;;  %10554 = vmatprep.mubr.f32.mxu1 %v12275_v10  ;;  %v8090_v61 = vand.u32 4294901760, %v8089_v6 }
 0x2b1   : > { %11152 = vmatprep.subr.bf16.mxu1 %v12205_v9 }
 0x2b2   : > { %v8091_v63 = vsub.f32 %v8089_v6, %v8090_v61 }
 0x2b4   : > { %v8092_v1 = vand.u32 4294901760, %v8091_v63 }
 0x2b7   : > { %10555 = vmatmul.mubr.f32.vlgmr.msra.gmra.mrb[8].mxu1 %v12318_v37 }
 0x2b8   : > { %11154 = vmatpush3.bf16.msra.mxu1 %v12205_v9  ;;  %10603 = vmatprep.mubr.f32.mxu1 %v6058_v30 }
 0x2b9   : > { %11156 = vmatprep.subr.bf16.mxu1 %v12209_v27 }
 0x2bb   : > { %10604 = vmatmul.mubr.f32.vlgmr.msra.gmra.mrb[10].mxu1 %v6068_v31 }
 0x2bc   : > { %11158 = vmatpush3.bf16.msra.mxu1 %v12209_v27  ;;  %10610 = vmatprep.mubr.f32.mxu1 %v6054_v18 }
 0x2bd   : > { %11160 = vmatprep.subr.bf16.mxu1 %v12211_v28 }
 0x2c3   : > { %10611 = vmatmul.mubr.f32.vlgmr.msra.gmra.mrb[10].mxu1 %v6064_v20 }
 0x2c4   : > { %11162 = vmatpush3.bf16.msra.mxu1 %v12211_v28  ;;  %10617 = vmatprep.mubr.f32.mxu1 %v6055_v21 }
 0x2c5   : > { %11164 = vmatprep.subr.bf16.mxu1 %v12205_v9 }
 0x2cb   : > { %10618 = vmatmul.mubr.f32.vlgmr.msra.gmra.mrb[10].mxu1 %v6065_v22  ;;  %v5609_v22 = vand.u32 4294901760, %v5608_v19 }
 0x2cc   : > { %11166 = vmatpush3.bf16.msra.mxu1 %v12205_v9  ;;  %10624 = vmatprep.mubr.f32.mxu1 %v6056_v23 }
 0x2cd   : > { %11168 = vmatprep.subr.bf16.mxu1 %v12218_v29 }
 0x2d3   : > { %10625 = vmatmul.mubr.f32.vlgmr.msra.gmra.mrb[10].mxu1 %v6066_v24 }
 0x2d4   : > { %11170 = vmatpush3.bf16.msra.mxu1 %v12218_v29  ;;  %10631 = vmatprep.mubr.f32.mxu1 %v6054_v18 }
 0x2d5   : > { %11172 = vmatprep.subr.bf16.mxu1 %v12205_v9 }
 0x2da   : > { %v12418_v44 = vpop.f32.mrb[0].mxu1 }
 0x2db   : > { %v12420_v45 = vpop.f32.mrb[1].mxu1  ;;  %10632 = vmatmul.mubr.f32.vlgmr.msra.gmra.mrb[10].mxu1 %v6064_v20  ;;  %v12493_v34 = vmul.f32 %v12418_v44, %v12418_v44 }
 0x2dc   : > { %11174 = vmatpush3.bf16.msra.mxu1 %v12205_v9  ;;  %10638 = vmatprep.mubr.f32.mxu1 %v6054_v18  ;;  %v5601_v18 = vsub.f32 %v5599_v11, %v5600_v15  ;;  %v12497_v36 = vmul.f32 %v12420_v45, %v12420_v45 }
 0x2dd   : > { %11200 = vmatprep.subr.bf16.mxu1 %v12205_v9 }
 0x2de   : > { %v5602_v21 = vand.u32 4294901760, %v5601_v18 }
 0x2e0   : > { %v12477_v30 = vpack.c.bf16 %v5609_v22, %v5602_v21 }
 0x2e3   : > { %10639 = vmatmul.mubr.f32.vlgmr.msra.gmra.mrb[10].mxu1 %v6064_v20 }
 0x2e4   : > { %11202 = vmatpush3.bf16.msra.mxu1 %v12205_v9  ;;  %10687 = vmatprep.mubr.f32.mxu1 %v7070_v49 }
 0x2e5   : > { %11204 = vmatprep.subr.bf16.mxu1 %v12209_v27 }
 0x2e7   : > { %10688 = vmatmul.mubr.f32.vlgmr.msra.gmra.mrb[12].mxu1 %v7080_v51 }
 0x2e8   : > { %11206 = vmatpush3.bf16.msra.mxu1 %v12209_v27  ;;  %10694 = vmatprep.mubr.f32.mxu1 %v7066_v35 }
 0x2e9   : > { %11208 = vmatprep.subr.bf16.mxu1 %v12211_v28 }
 0x2ef   : > { %10695 = vmatmul.mubr.f32.vlgmr.msra.gmra.mrb[12].mxu1 %v7076_v40 }
 0x2f0   : > { %11210 = vmatpush3.bf16.msra.mxu1 %v12211_v28  ;;  %10701 = vmatprep.mubr.f32.mxu1 %v7067_v41 }
 0x2f1   : > { %11212 = vmatprep.subr.bf16.mxu1 %v12205_v9 }
 0x2f7   : > { %10702 = vmatmul.mubr.f32.vlgmr.msra.gmra.mrb[12].mxu1 %v7077_v42 }
 0x2f8   : > { %11214 = vmatpush3.bf16.msra.mxu1 %v12205_v9  ;;  %10708 = vmatprep.mubr.f32.mxu1 %v7068_v43 }
 0x2f9   : > { %11216 = vmatprep.subr.bf16.mxu1 %v12218_v29 }
 0x2ff   : > { %10709 = vmatmul.mubr.f32.vlgmr.msra.gmra.mrb[12].mxu1 %v7078_v46 }
 0x300   : > { %11218 = vmatpush3.bf16.msra.mxu1 %v12218_v29  ;;  %10715 = vmatprep.mubr.f32.mxu1 %v7066_v35 }
 0x301   : > { %11220 = vmatprep.subr.bf16.mxu1 %v12205_v9 }
 0x306   : > { %v12446_v59 = vpop.f32.mrb[2].mxu1 }
 0x307   : > { %v12448_v60 = vpop.f32.mrb[3].mxu1  ;;  %10716 = vmatmul.mubr.f32.vlgmr.msra.gmra.mrb[12].mxu1 %v7076_v40  ;;  %v2431_v41 = vsub.f32 %v12446_v59, %v12493_v34 }
 0x308   : > { %11222 = vmatpush3.bf16.msra.mxu1 %v12205_v9  ;;  %10722 = vmatprep.mubr.f32.mxu1 %v7066_v35  ;;  %v2430_v42 = vsub.f32 %v12448_v60, %v12497_v36 }
 0x309   : > { %11248 = vmatprep.subr.bf16.mxu1 %v12205_v9  ;;  %v12505_v48 = vadd.f32 0.0009, %v2431_v41 }
 0x30a   : > { %v12507_v52 = vadd.f32 0.0009, %v2430_v42 }
 0x30f   : > { %10723 = vmatmul.mubr.f32.vlgmr.msra.gmra.mrb[12].mxu1 %v7076_v40 }
 0x310   : > { %11250 = vmatpush3.bf16.msra.mxu1 %v12205_v9  ;;  %10771 = vmatprep.mubr.f32.mxu1 %v8082_v0 }
 0x311   : > { %11252 = vmatprep.subr.bf16.mxu1 %v12209_v27 }
 0x313   : > { %10772 = vmatmul.mubr.f32.vlgmr.msra.gmra.mrb[14].mxu1 %v8092_v1 }
 0x314   : > { %11254 = vmatpush3.bf16.msra.mxu1 %v12209_v27  ;;  %10778 = vmatprep.mubr.f32.mxu1 %v12437_v55  ;;  %v11855_v27 = vmov 0.0|0.0  }
 0x315   : > { %11256 = vmatprep.subr.bf16.mxu1 %v12211_v28  ;;  %11133 = vmatprep.subr.bf16.mxu0 %v11855_v27 }
 0x316   : > { %11135 = vmatpush3.bf16.msra.mxu0 %v12463_v8 }
 0x317   : > { %11136 = vmatprep.subr.bf16.mxu0 %v11855_v27 }
 0x31b   : > { %10779 = vmatmul.mubr.f32.vlgmr.msra.gmra.mrb[14].mxu1 %v12440_v57 }
 0x31c   : > { %11258 = vmatpush3.bf16.msra.mxu1 %v12211_v28  ;;  %10785 = vmatprep.mubr.f32.mxu1 %v8079_v2  ;;  %v11857_v28 = vmov 0.0  }
 0x31d   : > { %11260 = vmatprep.subr.bf16.mxu1 %v12205_v9  ;;  %10561 = vmatprep.mubr.msk.f32.mxu0 %vm11856_vm1, %v11857_v28 }
 0x323   : > { %10786 = vmatmul.mubr.f32.vlgmr.msra.gmra.mrb[14].mxu1 %v8089_v6 }
 0x324   : > { %11262 = vmatpush3.bf16.msra.mxu1 %v12205_v9  ;;  %10792 = vmatprep.mubr.f32.mxu1 %v8080_v58 }
 0x325   : > { %11264 = vmatprep.subr.bf16.mxu1 %v12218_v29 }
 0x32b   : > { %10793 = vmatmul.mubr.f32.vlgmr.msra.gmra.mrb[14].mxu1 %v8090_v61 }
 0x32c   : > { %11266 = vmatpush3.bf16.msra.mxu1 %v12218_v29  ;;  %10799 = vmatprep.mubr.f32.mxu1 %v12437_v55 }
 0x32d   : > { %11268 = vmatprep.subr.bf16.mxu1 %v12205_v9 }
 0x332   : > { %v10388_v20 = vpop.f32.mrb[4].mxu1 }
 0x333   : > { %v5479_v23 = vmul.f32 2.0, %v10388_v20  ;;  %v3436_v24 = vpop.f32.mrb[5].mxu1  ;;  %10800 = vmatmul.mubr.f32.vlgmr.msra.gmra.mrb[14].mxu1 %v12440_v57  ;;  %v5475_v25 = vmul.f32 %v10388_v20, %v12418_v44  ;;  %v5471_v35 = vmul.f32 %v10388_v20, %v10388_v20 }
 0x334   : > { %v5478_v29 = vmul.f32 2.0, %v3436_v24  ;;  %11270 = vmatpush3.bf16.msra.mxu1 %v12205_v9  ;;  %10806 = vmatprep.mubr.f32.mxu1 %v12437_v55  ;;  %v5474_v26 = vmul.f32 %v3436_v24, %v12420_v45  ;;  %v12489_v9 = vpack.c.bf16 %v5607_v16, %v5600_v15  ;;  %v5470_v40 = vmul.f32 %v3436_v24, %v3436_v24 }
 0x335   : > { %v5481_v31 = vmul.f32 %v12418_v44, %v5479_v23  ;;  %11295 = vmatprep.subr.bf16.mxu1 %v11855_v27  ;;  %v5491_v43 = vadd.f32 %v5471_v35, %v12493_v34 }
 0x336   : > { %v5480_v32 = vmul.f32 %v5478_v29, %v12420_v45  ;;  %v5490_v47 = vadd.f32 %v5470_v40, %v12497_v36 }
 0x337   : > { %v5493_v54 = vadd.f32 0.0001, %v5491_v43  ;;  %v5483_v11 = vadd.f32 0.0001, %v5481_v31 }
 0x338   : > { %v5492_v56 = vadd.f32 0.0001, %v5490_v47  ;;  %v5482_v15 = vadd.f32 0.0001, %v5480_v32 }
 0x33b   : > { %10807 = vmatmul.mubr.f32.vlgmr.msra.gmra.mrb[14].mxu1 %v12440_v57 }
 0x33c   : > { %11297 = vmatpush3.bf16.msra.mxu1 %v12463_v8  ;;  %10855 = vmatprep.mubr.msk.f32.mxu1 %vm11856_vm1, %v11857_v28 }
 0x33d   : > { %11298 = vmatprep.subr.bf16.mxu1 %v11855_v27 }
 0x35e   : > { %v10472_v46 = vpop.f32.mrb[6].mxu1 }
 0x35f   : > { %v5473_v49 = vsub.f32 %v10472_v46, %v5471_v35  ;;  %v4448_v51 = vpop.f32.mrb[7].mxu1 }
 0x360   : > { %v5472_v53 = vsub.f32 %v4448_v51, %v5470_v40 }
 0x361   : > { %v5495_v55 = vadd.f32 %v5473_v49, %v12505_v48 }
 0x362   : > { %v5494_v57 = vadd.f32 %v5472_v53, %v12507_v52 }
 0x363   : > { %v5497_v2 = vmul.f32 %v5495_v55, %v5493_v54 }
 0x364   : > { %v5496_v6 = vmul.f32 %v5494_v57, %v5492_v56 }
 0x365   : > { %11585 = vrcp.f32 %v5497_v2 }
 0x366   : > { %11587 = vrcp.f32 %v5496_v6 }
 0x36f   : > { %v11586_v58 = vpop.eup %11585 }
 0x370   : > { %v11588_v59 = vpop.eup %11587  ;;  %v5501_v60 = vmul.f32 %v11586_v58, %v5497_v2 }
 0x371   : > { %v5500_v61 = vmul.f32 %v11588_v59, %v5496_v6 }
 0x372   : > { %v5503_v3 = vsub.f32 2.0, %v5501_v60 }
 0x373   : > { %v5502_v5 = vsub.f32 2.0, %v5500_v61 }
 0x374   : > { %v5505_v19 = vmul.f32 %v11586_v58, %v5503_v3 }
 0x375   : > { %v5504_v21 = vmul.f32 %v11588_v59, %v5502_v5 }
 0x38a   : > { %v10556_v62 = vpop.f32.mrb[8].mxu1 }
 0x38b   : > { %v5477_v63 = vsub.f32 %v10556_v62, %v5475_v25  ;;  %v5460_v0 = vpop.f32.mrb[9].mxu1 }
 0x38c   : > { %v5476_v1 = vsub.f32 %v5460_v0, %v5474_v26 }
 0x38d   : > { %v5485_v4 = vmul.f32 2.0, %v5477_v63 }
 0x38e   : > { %v5484_v7 = vmul.f32 2.0, %v5476_v1 }
 0x38f   : > { %v5487_v13 = vadd.f32 0.0009, %v5485_v4 }
 0x390   : > { %v5486_v16 = vadd.f32 0.0009, %v5484_v7 }
 0x391   : > { %v5489_v18 = vmul.f32 %v5487_v13, %v5483_v11 }
 0x392   : > { %v5488_v20 = vmul.f32 %v5486_v16, %v5482_v15 }
 0x393   : > { %v5507_v22 = vmul.f32 %v5505_v19, %v5489_v18 }
 0x394   : > { %v5506_v23 = vmul.f32 %v5504_v21, %v5488_v20 }
 0x395   : > { %v5509_v24 = vsel %vm399_vm0, %v5507_v22, 0.0 }
 0x396   : > { %v5508_v25 = vsel %vm399_vm0, %v5506_v23, 0.0 }
 0x397   : > { %v5510_v29 = vadd.f32 %v5509_v24, %v5508_v25 }
 0x399   : > { %v5511_v26 = vrot.slane %v5510_v29, 4 }
 0x39b   : > { %v5512_v35 = vadd.f32 %v5511_v26, %v5510_v29 }
 0x39d   : > { %v5513_v40 = vrot.slane %v5512_v35, 2 }
 0x39f   : > { %v5514_v41 = vadd.f32 %v5513_v40, %v5512_v35 }
 0x3a1   : > { %v5515_v42 = vrot.slane %v5514_v41, 1 }
 0x3a3   : > { %v5516_v31 = vadd.f32 %v5515_v42, %v5514_v41 }
 0x3a5   : > { %v5518_v32 = vsel %vm399_vm0, %v5516_v31, 0 }
 0x3a6   : > { %v5587_v43 = vand.u32 4294901760, %v5518_v32 }
 0x3a8   : > { %v5588_v46 = vsub.f32 %v5518_v32, %v5587_v43 }
 0x3aa   : > { %v5589_v47 = vand.u32 4294901760, %v5588_v46 }
 0x3ac   : > { %v5590_v49 = vsub.f32 %v5588_v46, %v5589_v47 }
 0x3ae   : > { %v5591_v51 = vand.u32 4294901760, %v5590_v49 }
 0x3b0   : > { %10562 = vmatmul.mubr.f32.vlgmr.msra.gmra.mrb[10].mxu0 %v5591_v51 }
 0x3b1   : > { %11138 = vmatpush3.bf16.msra.mxu0 %v12477_v30  ;;  %10568 = vmatprep.mubr.msk.f32.mxu0 %vm11856_vm1, %v11857_v28 }
 0x3b2   : > { %11139 = vmatprep.subr.bf16.mxu0 %v11855_v27 }
 0x3b6   : > { %v10640_v53 = vpop.f32.mrb[10].mxu1 }
 0x3b7   : > { %v6493_v54 = vand.u32 4294901760, %v10640_v53  ;;  %v6479_v55 = vpop.f32.mrb[11].mxu1 }
 0x3b8   : > { %v6490_v56 = vand.u32 4294901760, %v6479_v55  ;;  %10569 = vmatmul.mubr.f32.vlgmr.msra.gmra.mrb[10].mxu0 %v5587_v43 }
 0x3b9   : > { %v6585_v57 = vsub.f32 %v10640_v53, %v6493_v54  ;;  %11141 = vmatpush3.bf16.msra.mxu0 %v12483_v33  ;;  %10575 = vmatprep.mubr.msk.f32.mxu0 %vm11856_vm1, %v11857_v28 }
 0x3ba   : > { %v11175_v2 = vpack.c.bf16 %v6493_v54, %v6490_v56  ;;  %v6578_v6 = vsub.f32 %v6479_v55, %v6490_v56  ;;  %11142 = vmatprep.subr.bf16.mxu0 %v11855_v27 }
 0x3bb   : > { %v6586_v58 = vand.u32 4294901760, %v6585_v57 }
 0x3bc   : > { %v6579_v59 = vand.u32 4294901760, %v6578_v6  ;;  %v11183_v60 = vpack.c.bf16 %v6585_v57, %v6578_v6 }
 0x3bd   : > { %v6587_v61 = vsub.f32 %v6585_v57, %v6586_v58 }
 0x3be   : > { %v6580_v62 = vsub.f32 %v6578_v6, %v6579_v59  ;;  %v11191_v63 = vpack.c.bf16 %v6586_v58, %v6579_v59 }
 0x3bf   : > { %v6588_v0 = vand.u32 4294901760, %v6587_v61 }
 0x3c0   : > { %10576 = vmatmul.mubr.f32.vlgmr.msra.gmra.mrb[10].mxu0 %v5588_v46  ;;  %v6581_v1 = vand.u32 4294901760, %v6580_v62 }
 0x3c1   : > { %11144 = vmatpush3.bf16.msra.mxu0 %v12463_v8  ;;  %10582 = vmatprep.mubr.msk.f32.mxu0 %vm11856_vm1, %v11857_v28 }
 0x3c2   : > { %11145 = vmatprep.subr.bf16.mxu0 %v11855_v27  ;;  %v11179_v3 = vpack.c.bf16 %v6588_v0, %v6581_v1 }
 0x3c8   : > { %10583 = vmatmul.mubr.f32.vlgmr.msra.gmra.mrb[10].mxu0 %v5589_v47 }
 0x3c9   : > { %11147 = vmatpush3.bf16.msra.mxu0 %v12489_v9  ;;  %10589 = vmatprep.mubr.msk.f32.mxu0 %vm11856_vm1, %v11857_v28 }
 0x3ca   : > { %11148 = vmatprep.subr.bf16.mxu0 %v11855_v27 }
 0x3d0   : > { %10590 = vmatmul.mubr.f32.vlgmr.msra.gmra.mrb[10].mxu0 %v5587_v43 }
 0x3d1   : > { %11150 = vmatpush3.bf16.msra.mxu0 %v12463_v8  ;;  %10596 = vmatprep.mubr.msk.f32.mxu0 %vm11856_vm1, %v11857_v28 }
 0x3d2   : > { %11176 = vmatprep.subr.bf16.mxu0 %v11175_v2 }
 0x3d8   : > { %10597 = vmatmul.mubr.f32.vlgmr.msra.gmra.mrb[10].mxu0 %v5587_v43 }
 0x3d9   : > { %11178 = vmatpush3.bf16.msra.mxu0 %v11175_v2  ;;  %10645 = vmatprep.mubr.f32.mxu0 %v12287_v17 }
 0x3da   : > { %11180 = vmatprep.subr.bf16.mxu0 %v11179_v3 }
 0x3dc   : > { %10646 = vmatmul.mubr.f32.vlgmr.msra.gmra.mrb[12].mxu0 %v12328_v50 }
 0x3dd   : > { %11182 = vmatpush3.bf16.msra.mxu0 %v11179_v3  ;;  %10652 = vmatprep.mubr.f32.mxu0 %v12275_v10 }
 0x3de   : > { %11184 = vmatprep.subr.bf16.mxu0 %v11183_v60 }
 0x3e2   : > { %v10724_v4 = vpop.f32.mrb[12].mxu1 }
 0x3e3   : > { %v7505_v5 = vand.u32 4294901760, %v10724_v4  ;;  %v7491_v7 = vpop.f32.mrb[13].mxu1 }
 0x3e4   : > { %v7502_v11 = vand.u32 4294901760, %v7491_v7  ;;  %10653 = vmatmul.mubr.f32.vlgmr.msra.gmra.mrb[12].mxu0 %v12318_v37 }
 0x3e5   : > { %v7597_v13 = vsub.f32 %v10724_v4, %v7505_v5  ;;  %11186 = vmatpush3.bf16.msra.mxu0 %v11183_v60  ;;  %10659 = vmatprep.mubr.f32.mxu0 %v12278_v12 }
 0x3e6   : > { %v11223_v15 = vpack.c.bf16 %v7505_v5, %v7502_v11  ;;  %v7590_v16 = vsub.f32 %v7491_v7, %v7502_v11  ;;  %11188 = vmatprep.subr.bf16.mxu0 %v11175_v2 }
 0x3e7   : > { %v7598_v18 = vand.u32 4294901760, %v7597_v13 }
 0x3e8   : > { %v7591_v19 = vand.u32 4294901760, %v7590_v16  ;;  %v11231_v20 = vpack.c.bf16 %v7597_v13, %v7590_v16 }
 0x3e9   : > { %v7599_v21 = vsub.f32 %v7597_v13, %v7598_v18 }
 0x3ea   : > { %v7592_v22 = vsub.f32 %v7590_v16, %v7591_v19  ;;  %v11239_v23 = vpack.c.bf16 %v7598_v18, %v7591_v19 }
 0x3eb   : > { %v7600_v24 = vand.u32 4294901760, %v7599_v21 }
 0x3ec   : > { %10660 = vmatmul.mubr.f32.vlgmr.msra.gmra.mrb[12].mxu0 %v12321_v38  ;;  %v7593_v25 = vand.u32 4294901760, %v7592_v22 }
 0x3ed   : > { %11190 = vmatpush3.bf16.msra.mxu0 %v11175_v2  ;;  %10666 = vmatprep.mubr.f32.mxu0 %v12281_v14 }
 0x3ee   : > { %11192 = vmatprep.subr.bf16.mxu0 %v11191_v63  ;;  %v11227_v29 = vpack.c.bf16 %v7600_v24, %v7593_v25 }
 0x3f4   : > { %10667 = vmatmul.mubr.f32.vlgmr.msra.gmra.mrb[12].mxu0 %v12324_v39 }
 0x3f5   : > { %11194 = vmatpush3.bf16.msra.mxu0 %v11191_v63  ;;  %10673 = vmatprep.mubr.f32.mxu0 %v12275_v10 }
 0x3f6   : > { %11196 = vmatprep.subr.bf16.mxu0 %v11175_v2 }
 0x3fc   : > { %10674 = vmatmul.mubr.f32.vlgmr.msra.gmra.mrb[12].mxu0 %v12318_v37 }
 0x3fd   : > { %11198 = vmatpush3.bf16.msra.mxu0 %v11175_v2  ;;  %10680 = vmatprep.mubr.f32.mxu0 %v12275_v10 }
 0x3fe   : > { %11224 = vmatprep.subr.bf16.mxu0 %v11223_v15 }
 0x404   : > { %10681 = vmatmul.mubr.f32.vlgmr.msra.gmra.mrb[12].mxu0 %v12318_v37 }
 0x405   : > { %11226 = vmatpush3.bf16.msra.mxu0 %v11223_v15  ;;  %10729 = vmatprep.mubr.f32.mxu0 %v12287_v17 }
 0x406   : > { %11228 = vmatprep.subr.bf16.mxu0 %v11227_v29 }
 0x408   : > { %10730 = vmatmul.mubr.f32.vlgmr.msra.gmra.mrb[14].mxu0 %v12328_v50 }
 0x409   : > { %11230 = vmatpush3.bf16.msra.mxu0 %v11227_v29  ;;  %10736 = vmatprep.mubr.f32.mxu0 %v12275_v10 }
 0x40a   : > { %11232 = vmatprep.subr.bf16.mxu0 %v11231_v20 }
 0x40e   : > { %v10808_v26 = vpop.f32.mrb[14].mxu1 }
 0x40f   : > { %v8517_v35 = vand.u32 4294901760, %v10808_v26  ;;  %v8503_v40 = vpop.f32.mrb[15].mxu1 }
 0x410   : > { %v8514_v41 = vand.u32 4294901760, %v8503_v40  ;;  %10737 = vmatmul.mubr.f32.vlgmr.msra.gmra.mrb[14].mxu0 %v12318_v37 }
 0x411   : > { %v8609_v42 = vsub.f32 %v10808_v26, %v8517_v35  ;;  %11234 = vmatpush3.bf16.msra.mxu0 %v11231_v20  ;;  %10743 = vmatprep.mubr.f32.mxu0 %v12278_v12 }
 0x412   : > { %v11271_v31 = vpack.c.bf16 %v8517_v35, %v8514_v41  ;;  %v8602_v32 = vsub.f32 %v8503_v40, %v8514_v41  ;;  %11236 = vmatprep.subr.bf16.mxu0 %v11223_v15 }
 0x413   : > { %v8610_v43 = vand.u32 4294901760, %v8609_v42 }
 0x414   : > { %v8603_v46 = vand.u32 4294901760, %v8602_v32  ;;  %v11279_v47 = vpack.c.bf16 %v8609_v42, %v8602_v32 }
 0x415   : > { %v8611_v49 = vsub.f32 %v8609_v42, %v8610_v43 }
 0x416   : > { %v8604_v51 = vsub.f32 %v8602_v32, %v8603_v46  ;;  %v11287_v53 = vpack.c.bf16 %v8610_v43, %v8603_v46 }
 0x417   : > { %v8612_v54 = vand.u32 4294901760, %v8611_v49 }
 0x418   : > { %10744 = vmatmul.mubr.f32.vlgmr.msra.gmra.mrb[14].mxu0 %v12321_v38  ;;  %v8605_v55 = vand.u32 4294901760, %v8604_v51 }
 0x419   : > { %11238 = vmatpush3.bf16.msra.mxu0 %v11223_v15  ;;  %10750 = vmatprep.mubr.f32.mxu0 %v12281_v14 }
 0x41a   : > { %11240 = vmatprep.subr.bf16.mxu0 %v11239_v23  ;;  %v11275_v56 = vpack.c.bf16 %v8612_v54, %v8605_v55 }
 0x420   : > { %10751 = vmatmul.mubr.f32.vlgmr.msra.gmra.mrb[14].mxu0 %v12324_v39 }
 0x421   : > { %11242 = vmatpush3.bf16.msra.mxu0 %v11239_v23  ;;  %10757 = vmatprep.mubr.f32.mxu0 %v12275_v10 }
 0x422   : > { %11244 = vmatprep.subr.bf16.mxu0 %v11223_v15 }
 0x428   : > { %10758 = vmatmul.mubr.f32.vlgmr.msra.gmra.mrb[14].mxu0 %v12318_v37 }
 0x429   : > { %11246 = vmatpush3.bf16.msra.mxu0 %v11223_v15  ;;  %10764 = vmatprep.mubr.f32.mxu0 %v12275_v10 }
 0x42a   : > { %11272 = vmatprep.subr.bf16.mxu0 %v11271_v31 }
 0x430   : > { %10765 = vmatmul.mubr.f32.vlgmr.msra.gmra.mrb[14].mxu0 %v12318_v37 }
 0x431   : > { %11274 = vmatpush3.bf16.msra.mxu0 %v11271_v31  ;;  %10813 = vmatprep.mubr.f32.mxu0 %v12287_v17 }
 0x432   : > { %11276 = vmatprep.subr.bf16.mxu0 %v11275_v56 }
 0x434   : > { %10814 = vmatmul.mubr.f32.vlgmr.msra.gmra.mrb[16].mxu0 %v12328_v50 }
 0x435   : > { %11278 = vmatpush3.bf16.msra.mxu0 %v11275_v56  ;;  %10820 = vmatprep.mubr.f32.mxu0 %v12275_v10 }
 0x436   : > { %11280 = vmatprep.subr.bf16.mxu0 %v11279_v47 }
 0x43c   : > { %10821 = vmatmul.mubr.f32.vlgmr.msra.gmra.mrb[16].mxu0 %v12318_v37 }
 0x43d   : > { %11282 = vmatpush3.bf16.msra.mxu0 %v11279_v47  ;;  %10827 = vmatprep.mubr.f32.mxu0 %v12278_v12 }
 0x43e   : > { %11284 = vmatprep.subr.bf16.mxu0 %v11271_v31 }
 0x444   : > { %10828 = vmatmul.mubr.f32.vlgmr.msra.gmra.mrb[16].mxu0 %v12321_v38 }
 0x445   : > { %11286 = vmatpush3.bf16.msra.mxu0 %v11271_v31  ;;  %10834 = vmatprep.mubr.f32.mxu0 %v12281_v14 }
 0x446   : > { %11288 = vmatprep.subr.bf16.mxu0 %v11287_v53 }
 0x44c   : > { %10835 = vmatmul.mubr.f32.vlgmr.msra.gmra.mrb[16].mxu0 %v12324_v39 }
 0x44d   : > { %11290 = vmatpush3.bf16.msra.mxu0 %v11287_v53  ;;  %10841 = vmatprep.mubr.f32.mxu0 %v12275_v10 }
 0x44e   : > { %11292 = vmatprep.subr.bf16.mxu0 %v11271_v31 }
 0x454   : > { %10842 = vmatmul.mubr.f32.vlgmr.msra.gmra.mrb[16].mxu0 %v12318_v37 }
 0x455   : > { %11294 = vmatpush3.bf16.msra.mxu0 %v11271_v31  ;;  %10848 = vmatprep.mubr.f32.mxu0 %v12275_v10 }
 0x45c   : > { %10849 = vmatmul.mubr.f32.vlgmr.msra.gmra.mrb[16].mxu0 %v12318_v37 }
 0x4ab   : > { %v12569_v12 = vpop.f32.mrb[10].mxu0 }
 0x4ac   : > { %v10598_v17 = vpop.f32.mrb[11].mxu0 }
 0x4d7   : > { %v10682_v38 = vpop.f32.mrb[12].mxu0 }
 0x4d8   : > { %v9024_v50 = vmul.f32 2.0, %v10682_v38  ;;  %v6981_v14 = vpop.f32.mrb[13].mxu0  ;;  %v9020_v57 = vmul.f32 %v10682_v38, %v12418_v44  ;;  %v9016_v59 = vmul.f32 %v10682_v38, %v10682_v38 }
 0x4d9   : > { %v9023_v39 = vmul.f32 2.0, %v6981_v14  ;;  %v9019_v2 = vmul.f32 %v6981_v14, %v12420_v45  ;;  %v9015_v60 = vmul.f32 %v6981_v14, %v6981_v14 }
 0x4da   : > { %v9026_v6 = vmul.f32 %v12418_v44, %v9024_v50  ;;  %v9036_v10 = vadd.f32 %v9016_v59, %v12493_v34 }
 0x4db   : > { %v9025_v58 = vmul.f32 %v9023_v39, %v12420_v45  ;;  %v9035_v61 = vadd.f32 %v9015_v60, %v12497_v36 }
 0x4dc   : > { %v9038_v1 = vadd.f32 0.0001, %v9036_v10 }
 0x4dd   : > { %v9037_v4 = vadd.f32 0.0001, %v9035_v61  ;;  %v9027_v24 = vadd.f32 0.0001, %v9025_v58 }
 0x503   : > { %v10766_v37 = vpop.f32.mrb[14].mxu0 }
 0x504   : > { %v9018_v62 = vsub.f32 %v10766_v37, %v9016_v59  ;;  %v7993_v63 = vpop.f32.mrb[15].mxu0 }
 0x505   : > { %v9017_v0 = vsub.f32 %v7993_v63, %v9015_v60 }
 0x506   : > { %v9040_v3 = vadd.f32 %v9018_v62, %v12505_v48  ;;  %v9028_v48 = vadd.f32 0.0001, %v9026_v6 }
 0x507   : > { %v9039_v5 = vadd.f32 %v9017_v0, %v12507_v52 }
 0x508   : > { %v9042_v7 = vmul.f32 %v9040_v3, %v9038_v1 }
 0x509   : > { %v9041_v44 = vmul.f32 %v9039_v5, %v9037_v4 }
 0x50a   : > { %11589 = vrcp.f32 %v9042_v7 }
 0x50b   : > { %11591 = vrcp.f32 %v9041_v44 }
 0x514   : > { %v11590_v45 = vpop.eup %11589 }
 0x515   : > { %v11592_v11 = vpop.eup %11591  ;;  %v9046_v13 = vmul.f32 %v11590_v45, %v9042_v7 }
 0x516   : > { %v9045_v34 = vmul.f32 %v11592_v11, %v9041_v44 }
 0x517   : > { %v9048_v19 = vsub.f32 2.0, %v9046_v13 }
 0x518   : > { %v9047_v21 = vsub.f32 2.0, %v9045_v34 }
 0x519   : > { %v9050_v29 = vmul.f32 %v11590_v45, %v9048_v19 }
 0x51a   : > { %v9049_v35 = vmul.f32 %v11592_v11, %v9047_v21 }
 0x52f   : > { %v10850_v15 = vpop.f32.mrb[16].mxu0 }
 0x530   : > { %v9022_v16 = vsub.f32 %v10850_v15, %v9020_v57  ;;  %v9005_v36 = vpop.f32.mrb[17].mxu0 }
 0x531   : > { %v9021_v18 = vsub.f32 %v9005_v36, %v9019_v2 }
 0x532   : > { %v9030_v20 = vmul.f32 2.0, %v9022_v16 }
 0x533   : > { %v9029_v22 = vmul.f32 2.0, %v9021_v18 }
 0x534   : > { %v9032_v23 = vadd.f32 0.0009, %v9030_v20 }
 0x535   : > { %v9031_v52 = vadd.f32 0.0009, %v9029_v22 }
 0x536   : > { %v9034_v25 = vmul.f32 %v9032_v23, %v9028_v48 }
 0x537   : > { %v9033_v26 = vmul.f32 %v9031_v52, %v9027_v24 }
 0x538   : > { %v9052_v40 = vmul.f32 %v9050_v29, %v9034_v25 }
 0x539   : > { %v9051_v41 = vmul.f32 %v9049_v35, %v9033_v26 }
 0x53a   : > { %v9054_v42 = vsel %vm399_vm0, %v9052_v40, 0.0 }
 0x53b   : > { %v9053_v31 = vsel %vm399_vm0, %v9051_v41, 0.0 }
 0x53c   : > { %v9055_v32 = vadd.f32 %v9054_v42, %v9053_v31 }
 0x53e   : > { %v9056_v43 = vrot.slane %v9055_v32, 4 }
 0x540   : > { %v9057_v46 = vadd.f32 %v9056_v43, %v9055_v32 }
 0x542   : > { %v9058_v47 = vrot.slane %v9057_v46, 2 }
 0x544   : > { %v9059_v49 = vadd.f32 %v9058_v47, %v9057_v46 }
 0x546   : > { %v9060_v51 = vrot.slane %v9059_v49, 1 }
 0x548   : > { %v9061_v53 = vadd.f32 %v9060_v51, %v9059_v49 }
 0x54a   : > { %v9063_v54 = vsel %vm399_vm0, %v9061_v53, 0 }
 0x54b   : > { %v9132_v55 = vand.u32 4294901760, %v9063_v54 }
 0x54d   : > { %v9133_v56 = vsub.f32 %v9063_v54, %v9132_v55 }
 0x54f   : > { %v9134_v17 = vand.u32 4294901760, %v9133_v56 }
 0x551   : > { %v9135_v38 = vsub.f32 %v9133_v56, %v9134_v17 }
 0x553   : > { %v9136_v50 = vand.u32 4294901760, %v9135_v38 }
 0x555   : > { %10856 = vmatmul.mubr.f32.vlgmr.msra.gmra.mrb[16].mxu1 %v9136_v50 }
 0x556   : > { %11300 = vmatpush3.bf16.msra.mxu1 %v12477_v30  ;;  %10862 = vmatprep.mubr.msk.f32.mxu1 %vm11856_vm1, %v11857_v28 }
 0x557   : > { %11301 = vmatprep.subr.bf16.mxu1 %v11855_v27 }
 0x55d   : > { %10863 = vmatmul.mubr.f32.vlgmr.msra.gmra.mrb[16].mxu1 %v9132_v55 }
 0x55e   : > { %11303 = vmatpush3.bf16.msra.mxu1 %v12483_v33  ;;  %10869 = vmatprep.mubr.msk.f32.mxu1 %vm11856_vm1, %v11857_v28 }
 0x55f   : > { %11304 = vmatprep.subr.bf16.mxu1 %v11855_v27 }
 0x565   : > { %10870 = vmatmul.mubr.f32.vlgmr.msra.gmra.mrb[16].mxu1 %v9133_v56 }
 0x566   : > { %11306 = vmatpush3.bf16.msra.mxu1 %v12463_v8  ;;  %10876 = vmatprep.mubr.msk.f32.mxu1 %vm11856_vm1, %v11857_v28 }
 0x567   : > { %11307 = vmatprep.subr.bf16.mxu1 %v11855_v27 }
 0x56d   : > { %10877 = vmatmul.mubr.f32.vlgmr.msra.gmra.mrb[16].mxu1 %v9134_v17 }
 0x56e   : > { %11309 = vmatpush3.bf16.msra.mxu1 %v12489_v9  ;;  %10883 = vmatprep.mubr.msk.f32.mxu1 %vm11856_vm1, %v11857_v28 }
 0x56f   : > { %11310 = vmatprep.subr.bf16.mxu1 %v11855_v27 }
 0x575   : > { %10884 = vmatmul.mubr.f32.vlgmr.msra.gmra.mrb[16].mxu1 %v9132_v55 }
 0x576   : > { %11312 = vmatpush3.bf16.msra.mxu1 %v12463_v8  ;;  %10890 = vmatprep.mubr.msk.f32.mxu1 %vm11856_vm1, %v11857_v28 }
 0x57d   : > { %10891 = vmatmul.mubr.f32.vlgmr.msra.gmra.mrb[16].mxu1 %v9132_v55 }
 0x650   : > { %v9520_v30 = vpop.f32.mrb[16].mxu1 }
 0x651   : > { %v9525_v33 = vrot.slane %v9520_v30, 7  ;;  %v10892_v9 = vpop.f32.mrb[17].mxu1 }
 0x653   : > { %v9528_v27 = vsel %vm9527_vm2, %v12569_v12, %v9525_v33 }
 0x654   : > { %9530 = vst.msk [vmem:[%s390_s10] sm:$0x3] %vm9529_vm3, %v9528_v27 }
 0x655   : > { %11780 = shalt.err (!%p11777_p5)
}
 0x656   : > { %s11781_s21 = scalar_lea.hbm %s12606_s3, 32  ;;  %s11785_s18 = scalar_lea.hbm %s12719_s17, 64 }
 0x657   : > { %p11782_p8 = scmp.ne.s32.totalorder %s12606_s3, %s11781_s21  ;;  %p11786_p11 = scmp.lt.u32.totalorder %s12606_s3, %s12719_s17 }
 0x658   : > { %p11787_p13 = scmp.lt.u32.totalorder %s11785_s18, %s11781_s21  ;;  %p11789_p7 = scmp.lt.u32.totalorder %s11781_s21, %s12606_s3 }
 0x659   : > { %p11783_p1 = pnand %p11782_p8, %p12720_p12 }
 0x65a   : > { %p11788_p3 = por %p11787_p13, %p11786_p11 }
 0x65b   : > { %p11784_p0 = pneg %p11783_p1 }
 0x65c   : > { %p11790_p2 = por %p11789_p7, %p11788_p3 }
 0x65e   : > { %p11791_p6 = pnand %p11790_p2, %p11784_p0 }
 0x660   : > { %11794 = shalt.err (!%p11791_p6)
}
 0x661   : > { %11511 = dma.vmem_to_hbm [thread:$0]  (%p12720_p12), %s12608_s20, 32, %s12606_s3, %s9532_s25  }
 0x662 PF: > { %s12721_s6 = sld [smem:[#allocation19_spill]]  ;;  %s12722_s11 = sld [smem:[#allocation24_spill]] }
 0x663   : > { %s12723_s7 = sld [smem:[#allocation20_spill]] }
 0x668   : > { %s9557_s19 = sand.u32 1, %s12721_s6   ;;  %p12724_p9 = scmp.ne.s32.totalorder %s12722_s11, 0 }
 0x669   : > { %p12725_p10 = scmp.ge.s32.totalorder %s12723_s7, 2  ;;  %s9558_s26 = scalar_lea.sflag [#allocation4], %s9557_s19 }
 0x66b   : > { %p11534_p4 = pnand %p12725_p10, %p12724_p9 }
 0x66d   : > { %11828 = dma.done.wait (!%p11534_p4), %s9558_s26, 32  }
 0x66e   : > { %11830 = vsyncadd (!%p11534_p4), %s9558_s26, 4294967264  ;;  %s12726_s24 = sld [smem:[#allocation21_spill]]  ;;  %s12727_s8 = sld [smem:[#allocation22_spill]] }
 0x66f   : > { %s12728_s21 = smov %s11837_s22  ;;  %s12729_s22 = smov %s11841_s23 }
 0x674   : > { %p24_p5 = scmp.ge.s32.totalorder %s12726_s24, 4   ;;  %s12730_s23 = smov %s12727_s8 }
 0x676   :  { %26 = sbr.rel (!%p24_p5) target bundleno = 13 (0xd), region = 125 }
 0x67d   :  { %9563 = vsyncpa [#allocation3], 1 }
 0x67e   :  { %9565 = vsyncpa [#allocation3 + $0x1], 1 }
 0x67f   :  { %9566 = vsyncpa [#allocation6], 1 }
 0x680   :  { %9568 = vsyncpa [#allocation6 + $0x1], 1 }
 0x681   :  { %9569 = vsyncpa [#allocation9], 1 }
 0x682   :  { %9570 = vsyncpa [#allocation12], 1 }
 0x683   :  { %9571 = vsyncpa [#allocation4], 1 }
 0x684   :  { %9573 = vsyncpa [#allocation4 + $0x1], 1 }

</bundles_post_ra>
